<compile_context>
chip_gen: v6e
topology: v6e:2x2x1
jax: 0.10.0
libtpu: 0.0.40
codegen_flags: <defaults>
</compile_context>

<pallas_src>
import functools

import jax
import jax.numpy as jnp
from jax.experimental import pallas as pl
from jax.experimental.pallas import tpu as pltpu

_HIGHEST = jax.lax.Precision.HIGHEST


def _round_up(n: int, m: int) -> int:
    return ((n + m - 1) // m) * m


def dynamics_mlp_kernel(x_ref,
                        w1_ref, b1_ref,
                        w2_ref, b2_ref,
                        w3_ref, b3_ref,
                        w4_ref, b4_ref,
                        o_ref):
    """One batch tile of the 4->64->32->16->2 MLP.

    x_ref is (TB, 4) exactly as stored in HBM (batch-major); the transpose to
    feature-major is folded into the first matmul by contracting dim 1 of both
    operands (w1 is (64, 4), x is (TB, 4) -> result (64, TB)).  All later
    activations are feature-major so the batch rides the 128-wide lane axis
    and every intermediate / the output store is a full-width, unmasked vst.
    """
    x = x_ref[...]                                             # (TB, 4)
    h = jax.lax.dot_general(
        w1_ref[...], x, (((1,), (1,)), ((), ())),
        preferred_element_type=jnp.float32, precision=_HIGHEST)
    h = jnp.maximum(h + b1_ref[...], 0.0)                      # (64, TB)
    h = jnp.dot(w2_ref[...], h,
                preferred_element_type=jnp.float32, precision=_HIGHEST)
    h = jnp.maximum(h + b2_ref[...], 0.0)                      # (32, TB)
    h = jnp.dot(w3_ref[...], h,
                preferred_element_type=jnp.float32, precision=_HIGHEST)
    h = jnp.maximum(h + b3_ref[...], 0.0)                      # (16, TB)
    out = jnp.dot(w4_ref[...], h,
                  preferred_element_type=jnp.float32, precision=_HIGHEST)
    out = out + b4_ref[...]                                    # (2, TB)
    o_ref[...] = out.astype(o_ref.dtype)
    # TODO(synk): if a per-unit bundle count ever shows the MXU (vmatmul/pop)
    # slot saturated, lower the K=4 (layer 1) and M=2 (layer 4) matmuls to VPU
    # broadcast-FMA and keep only layers 2-3 on the MXU.


def _choose_tiling(B: int, max_tile_b: int):
    """Adaptive batch tiling: bound the tile size, bound padding waste, and
    give the 'parallel' grid axis >= 2 steps once B is large enough so v7x's
    second TensorCore is used (no effect on single-TC v5e/v6e)."""
    num_tiles = max(pl.cdiv(B, max_tile_b), 1)
    if B > 256:
        num_tiles = max(num_tiles, 2)
    TB = _round_up(pl.cdiv(B, num_tiles), 128)
    B_pad = _round_up(B, TB)
    return TB, B_pad, B_pad // TB


def dynamics_model_forward(x, params, *, max_tile_b: int = 8192):
    """x: (B, 4) float32. params: weights (out, in), biases (out, 1). -> (B, 2)."""
    B = x.shape[0]
    w1, b1 = params["w1"], params["b1"]
    w2, b2 = params["w2"], params["b2"]
    w3, b3 = params["w3"], params["b3"]
    w4, b4 = params["w4"], params["b4"]

    TB, B_pad, num_tiles = _choose_tiling(B, max_tile_b)

    # Tail-only pad of the batch dim (no transpose, no zeros+scatter HBM pass).
    x_in = x if B_pad == B else jnp.pad(x, ((0, B_pad - B), (0, 0)))

    # Weights/biases stay VMEM-resident: constant index_map, block == array.
    # TODO(synk): mark these pipeline_mode=pl.Buffered(1) once single-buffered
    # constant operands are universally supported; minor hygiene only.
    resident = lambda a: pl.BlockSpec(a.shape, lambda i: (0,) * a.ndim)

    flops = 2 * B_pad * (4 * 64 + 64 * 32 + 32 * 16 + 16 * 2)
    weight_bytes = sum(int(a.size) * 4
                       for a in (w1, b1, w2, b2, w3, b3, w4, b4))
    bytes_accessed = B_pad * 4 * 4 + B_pad * 2 * 4 + weight_bytes

    out_t = pl.pallas_call(
        dynamics_mlp_kernel,
        out_shape=jax.ShapeDtypeStruct((2, B_pad), jnp.float32),
        grid=(num_tiles,),
        in_specs=[
            pl.BlockSpec((TB, 4), lambda i: (i, 0)),   # x streams over batch
            resident(w1), resident(b1),
            resident(w2), resident(b2),
            resident(w3), resident(b3),
            resident(w4), resident(b4),
        ],
        out_specs=pl.BlockSpec((2, TB), lambda i: (0, i)),  # lane-dense store
        compiler_params=pltpu.CompilerParams(
            dimension_semantics=("parallel",),
            # TB=8192 keeps ~12 MiB of live tile buffers; raise the scoped
            # VMEM limit above v5e's 16 MiB default (well under physical VMEM
            # on every generation, including v7x's 64 MiB).
            vmem_limit_bytes=32 * 1024 * 1024,
        ),
        cost_estimate=pl.CostEstimate(
            flops=flops, transcendentals=0, bytes_accessed=bytes_accessed),
    )(x_in, w1, b1, w2, b2, w3, b3, w4, b4)

    # Output is only 2 features wide; this transpose is negligible.
    return out_t[:, :B].T


def init_params(key):
    """Matches PyTorch nn.Linear default init: U(-1/sqrt(fan_in), +1/sqrt(fan_in)).

    Weights stored PyTorch-native as (out_features, in_features); biases as
    (out_features, 1) so they broadcast over the lane (batch) axis.
    """
    dims = [4, 64, 32, 16, 2]
    params = {}
    for i in range(4):
        fan_in, fan_out = dims[i], dims[i + 1]
        key, kw, kb = jax.random.split(key, 3)
        bound = 1.0 / jnp.sqrt(fan_in)
        params[f"w{i + 1}"] = jax.random.uniform(
            kw, (fan_out, fan_in), jnp.float32, -bound, bound)
        params[f"b{i + 1}"] = jax.random.uniform(
            kb, (fan_out, 1), jnp.float32, -bound, bound)
    return params


def reference_forward(x, params):
    # Pure-JAX reference in the same (out, in) weight convention, pinned to
    # full f32 precision so the 1e-5 comparison is apples-to-apples.
    dot = functools.partial(jnp.dot, precision=_HIGHEST)
    h = jnp.maximum(dot(x, params["w1"].T) + params["b1"].T, 0.0)
    h = jnp.maximum(dot(h, params["w2"].T) + params["b2"].T, 0.0)
    h = jnp.maximum(dot(h, params["w3"].T) + params["b3"].T, 0.0)
    return dot(h, params["w4"].T) + params["b4"].T


if __name__ == "__main__":
    key = jax.random.PRNGKey(0)
    key, kx1, kx2 = jax.random.split(key, 3)
    params = init_params(key)

    # 1) Small smoke test (single tile, B < TB).
    B1 = 8
    x1 = jax.random.normal(kx1, (B1, 4), dtype=jnp.float32)
    out1 = jax.block_until_ready(dynamics_model_forward(x1, params))
    ref1 = reference_forward(x1, params)
    assert out1.shape == (B1, 2), out1.shape
    assert jnp.allclose(out1, ref1, atol=1e-5, rtol=1e-5), "mismatch (B=8)"

    # 2) Multi-tile + ragged-tail path (num_tiles=2, B % TB != 0): exercises
    # the megacore-parallel grid and the slice-off of padded batch rows.
    B2 = 300
    x2 = jax.random.normal(kx2, (B2, 4), dtype=jnp.float32)
    out2 = jax.block_until_ready(dynamics_model_forward(x2, params))
    ref2 = reference_forward(x2, params)
    assert out2.shape == (B2, 2), out2.shape
    assert jnp.allclose(out2, ref2, atol=1e-5, rtol=1e-5), "mismatch (B=300)"

    print("KERNEL_OK")
</pallas_src>

<mosaic_0001>
module attributes {stable_mosaic.version = 11 : i64} {
  func.func @dynamics_mlp_kernel(%arg0: i32, %arg1: memref<128x4xf32, #tpu.memory_space<vmem>>, %arg2: memref<64x4xf32, #tpu.memory_space<vmem>>, %arg3: memref<64x1xf32, #tpu.memory_space<vmem>>, %arg4: memref<32x64xf32, #tpu.memory_space<vmem>>, %arg5: memref<32x1xf32, #tpu.memory_space<vmem>>, %arg6: memref<16x32xf32, #tpu.memory_space<vmem>>, %arg7: memref<16x1xf32, #tpu.memory_space<vmem>>, %arg8: memref<2x16xf32, #tpu.memory_space<vmem>>, %arg9: memref<2x1xf32, #tpu.memory_space<vmem>>, %arg10: memref<2x128xf32, #tpu.memory_space<vmem>>) attributes {dimension_semantics = [#tpu.dimension_semantics<parallel>], iteration_bounds = array<i64: 1>, scalar_prefetch = 0 : i64, scratch_operands = 0 : i64, tpu.core_type = #tpu.core_type<tc>, window_params = [{transform_indices = @transform_0, window_bounds = array<i64: 128, 4>}, {pipeline_mode = #tpu.pipeline_mode<synchronous>, transform_indices = @transform_1, window_bounds = array<i64: 64, 4>}, {pipeline_mode = #tpu.pipeline_mode<synchronous>, transform_indices = @transform_2, window_bounds = array<i64: 64, 1>}, {pipeline_mode = #tpu.pipeline_mode<synchronous>, transform_indices = @transform_3, window_bounds = array<i64: 32, 64>}, {pipeline_mode = #tpu.pipeline_mode<synchronous>, transform_indices = @transform_4, window_bounds = array<i64: 32, 1>}, {pipeline_mode = #tpu.pipeline_mode<synchronous>, transform_indices = @transform_5, window_bounds = array<i64: 16, 32>}, {pipeline_mode = #tpu.pipeline_mode<synchronous>, transform_indices = @transform_6, window_bounds = array<i64: 16, 1>}, {pipeline_mode = #tpu.pipeline_mode<synchronous>, transform_indices = @transform_7, window_bounds = array<i64: 2, 16>}, {pipeline_mode = #tpu.pipeline_mode<synchronous>, transform_indices = @transform_8, window_bounds = array<i64: 2, 1>}, {transform_indices = @transform_9, window_bounds = array<i64: 2, 128>}]} {
    %c0 = arith.constant 0 : index
    %c0_0 = arith.constant 0 : index
    %0 = vector.load %arg1[%c0, %c0_0] : memref<128x4xf32, #tpu.memory_space<vmem>>, vector<128x4xf32>
    %c0_1 = arith.constant 0 : index
    %c0_2 = arith.constant 0 : index
    %1 = vector.load %arg2[%c0_1, %c0_2] : memref<64x4xf32, #tpu.memory_space<vmem>>, vector<64x4xf32>
    %cst = arith.constant dense<0.000000e+00> : vector<64x128xf32>
    %2 = tpu.matmul %1, %0, %cst {dimension_numbers = #tpu.dot_dimension_numbers<[1], [1], [0], [0], [0, 0, 1, 0], [], []>, precision = #tpu.contract_precision<fp32>} : vector<64x4xf32>, vector<128x4xf32>, vector<64x128xf32> -> vector<64x128xf32>
    %c0_3 = arith.constant 0 : index
    %c0_4 = arith.constant 0 : index
    %3 = vector.load %arg3[%c0_3, %c0_4] : memref<64x1xf32, #tpu.memory_space<vmem>>, vector<64x1xf32>
    %4 = vector.broadcast %3 : vector<64x1xf32> to vector<64x128xf32>
    %5 = arith.addf %2, %4 : vector<64x128xf32>
    %cst_5 = arith.constant 0.000000e+00 : f32
    %6 = vector.broadcast %cst_5 : f32 to vector<64x128xf32>
    %7 = arith.maximumf %5, %6 : vector<64x128xf32>
    %c0_6 = arith.constant 0 : index
    %c0_7 = arith.constant 0 : index
    %8 = vector.load %arg4[%c0_6, %c0_7] : memref<32x64xf32, #tpu.memory_space<vmem>>, vector<32x64xf32>
    %cst_8 = arith.constant dense<0.000000e+00> : vector<32x128xf32>
    %9 = tpu.matmul %8, %7, %cst_8 {dimension_numbers = #tpu.dot_dimension_numbers<[1], [0], [0], [1], [0, 0, 1, 1], [], []>, precision = #tpu.contract_precision<fp32>} : vector<32x64xf32>, vector<64x128xf32>, vector<32x128xf32> -> vector<32x128xf32>
    %c0_9 = arith.constant 0 : index
    %c0_10 = arith.constant 0 : index
    %10 = vector.load %arg5[%c0_9, %c0_10] : memref<32x1xf32, #tpu.memory_space<vmem>>, vector<32x1xf32>
    %11 = vector.broadcast %10 : vector<32x1xf32> to vector<32x128xf32>
    %12 = arith.addf %9, %11 : vector<32x128xf32>
    %cst_11 = arith.constant 0.000000e+00 : f32
    %13 = vector.broadcast %cst_11 : f32 to vector<32x128xf32>
    %14 = arith.maximumf %12, %13 : vector<32x128xf32>
    %c0_12 = arith.constant 0 : index
    %c0_13 = arith.constant 0 : index
    %15 = vector.load %arg6[%c0_12, %c0_13] : memref<16x32xf32, #tpu.memory_space<vmem>>, vector<16x32xf32>
    %cst_14 = arith.constant dense<0.000000e+00> : vector<16x128xf32>
    %16 = tpu.matmul %15, %14, %cst_14 {dimension_numbers = #tpu.dot_dimension_numbers<[1], [0], [0], [1], [0, 0, 1, 1], [], []>, precision = #tpu.contract_precision<fp32>} : vector<16x32xf32>, vector<32x128xf32>, vector<16x128xf32> -> vector<16x128xf32>
    %c0_15 = arith.constant 0 : index
    %c0_16 = arith.constant 0 : index
    %17 = vector.load %arg7[%c0_15, %c0_16] : memref<16x1xf32, #tpu.memory_space<vmem>>, vector<16x1xf32>
    %18 = vector.broadcast %17 : vector<16x1xf32> to vector<16x128xf32>
    %19 = arith.addf %16, %18 : vector<16x128xf32>
    %cst_17 = arith.constant 0.000000e+00 : f32
    %20 = vector.broadcast %cst_17 : f32 to vector<16x128xf32>
    %21 = arith.maximumf %19, %20 : vector<16x128xf32>
    %c0_18 = arith.constant 0 : index
    %c0_19 = arith.constant 0 : index
    %22 = vector.load %arg8[%c0_18, %c0_19] : memref<2x16xf32, #tpu.memory_space<vmem>>, vector<2x16xf32>
    %cst_20 = arith.constant dense<0.000000e+00> : vector<2x128xf32>
    %23 = tpu.matmul %22, %21, %cst_20 {dimension_numbers = #tpu.dot_dimension_numbers<[1], [0], [0], [1], [0, 0, 1, 1], [], []>, precision = #tpu.contract_precision<fp32>} : vector<2x16xf32>, vector<16x128xf32>, vector<2x128xf32> -> vector<2x128xf32>
    %c0_21 = arith.constant 0 : index
    %c0_22 = arith.constant 0 : index
    %24 = vector.load %arg9[%c0_21, %c0_22] : memref<2x1xf32, #tpu.memory_space<vmem>>, vector<2x1xf32>
    %25 = vector.broadcast %24 : vector<2x1xf32> to vector<2x128xf32>
    %26 = arith.addf %23, %25 : vector<2x128xf32>
    %c0_23 = arith.constant 0 : index
    %c0_24 = arith.constant 0 : index
    %27 = vector.load %arg10[%c0_23, %c0_24] : memref<2x128xf32, #tpu.memory_space<vmem>>, vector<2x128xf32>
    tpu.vector_store %arg10[%c0_23, %c0_24], %26 {strides = array<i32>} : memref<2x128xf32, #tpu.memory_space<vmem>>, vector<2x128xf32>,
    return
  }
  func.func @transform_0(%arg0: i32) -> (i32, i32) {
    %c0_i32 = arith.constant 0 : i32
    %c0_i32_0 = arith.constant 0 : i32
    return %arg0, %c0_i32 : i32, i32
  }
  func.func @transform_1(%arg0: i32) -> (i32, i32) {
    %c0_i32 = arith.constant 0 : i32
    %c0_i32_0 = arith.constant 0 : i32
    %c0_i32_1 = arith.constant 0 : i32
    return %c0_i32, %c0_i32_0 : i32, i32
  }
  func.func @transform_2(%arg0: i32) -> (i32, i32) {
    %c0_i32 = arith.constant 0 : i32
    %c0_i32_0 = arith.constant 0 : i32
    %c0_i32_1 = arith.constant 0 : i32
    return %c0_i32, %c0_i32_0 : i32, i32
  }
  func.func @transform_3(%arg0: i32) -> (i32, i32) {
    %c0_i32 = arith.constant 0 : i32
    %c0_i32_0 = arith.constant 0 : i32
    %c0_i32_1 = arith.constant 0 : i32
    return %c0_i32, %c0_i32_0 : i32, i32
  }
  func.func @transform_4(%arg0: i32) -> (i32, i32) {
    %c0_i32 = arith.constant 0 : i32
    %c0_i32_0 = arith.constant 0 : i32
    %c0_i32_1 = arith.constant 0 : i32
    return %c0_i32, %c0_i32_0 : i32, i32
  }
  func.func @transform_5(%arg0: i32) -> (i32, i32) {
    %c0_i32 = arith.constant 0 : i32
    %c0_i32_0 = arith.constant 0 : i32
    %c0_i32_1 = arith.constant 0 : i32
    return %c0_i32, %c0_i32_0 : i32, i32
  }
  func.func @transform_6(%arg0: i32) -> (i32, i32) {
    %c0_i32 = arith.constant 0 : i32
    %c0_i32_0 = arith.constant 0 : i32
    %c0_i32_1 = arith.constant 0 : i32
    return %c0_i32, %c0_i32_0 : i32, i32
  }
  func.func @transform_7(%arg0: i32) -> (i32, i32) {
    %c0_i32 = arith.constant 0 : i32
    %c0_i32_0 = arith.constant 0 : i32
    %c0_i32_1 = arith.constant 0 : i32
    return %c0_i32, %c0_i32_0 : i32, i32
  }
  func.func @transform_8(%arg0: i32) -> (i32, i32) {
    %c0_i32 = arith.constant 0 : i32
    %c0_i32_0 = arith.constant 0 : i32
    %c0_i32_1 = arith.constant 0 : i32
    return %c0_i32, %c0_i32_0 : i32, i32
  }
  func.func @transform_9(%arg0: i32) -> (i32, i32) {
    %c0_i32 = arith.constant 0 : i32
    %c0_i32_0 = arith.constant 0 : i32
    return %c0_i32, %arg0 : i32, i32
  }
}

</mosaic_0001>

<bundles_post_ra>
// kernel: tpu_custom_call.1
= control target key start
LH: loop header
LB: loop body
LE: loop exit
PB: predicated region body
PF: predicated region fallthrough
CT: control target
= control target key end

     0   :  { %vm105_vm0 = vcmask 31744   ;;  %s4682_s0 = inlined_call_operand.vmem [shape: f32[128,4], index: 0, kind: input, shape index: {}]   ;;  %s4683_s1 = inlined_call_operand.vmem [shape: f32[64,4], index: 1, kind: input, shape index: {}]   ;;  %s4684_s2 = inlined_call_operand.vmem [shape: f32[64,1], index: 2, kind: input, shape index: {}]   ;;  %s4685_s3 = inlined_call_operand.vmem [shape: f32[32,64], index: 3, kind: input, shape index: {}]   ;;  %s4686_s4 = inlined_call_operand.vmem [shape: f32[32,1], index: 4, kind: input, shape index: {}]   ;;  %s4687_s5 = inlined_call_operand.vmem [shape: f32[16,32], index: 5, kind: input, shape index: {}]   ;;  %s4688_s6 = inlined_call_operand.vmem [shape: f32[16,1], index: 6, kind: input, shape index: {}]   ;;  %s4689_s7 = inlined_call_operand.vmem [shape: f32[2,16], index: 7, kind: input, shape index: {}]   ;;  %s4690_s8 = inlined_call_operand.vmem [shape: f32[2,1], index: 8, kind: input, shape index: {}]   ;;  %s4691_s9 = inlined_call_operand.hbm [shape: f32[2,128], index: 9, kind: output, shape index: {}]  }
   0x1   :  { %v48_v0 = vld [vmem:[%s4682_s0 + $0x78] sm:$0xff]  ;;  %v47_v1 = vld [vmem:[%s4682_s0 + $0x70] sm:$0xff]  ;;  %v46_v2 = vld [vmem:[%s4682_s0 + $0x68] sm:$0xff] }
   0x2   :  { %v176_v3 = vsel %vm105_vm0, %v48_v0, 0  ;;  %v173_v4 = vsel %vm105_vm0, %v47_v1, 0  ;;  %v170_v5 = vsel %vm105_vm0, %v46_v2, 0  ;;  %v45_v6 = vld [vmem:[%s4682_s0 + $0x60] sm:$0xff]  ;;  %v44_v7 = vld [vmem:[%s4682_s0 + $0x58] sm:$0xff]  ;;  %v43_v12 = vld [vmem:[%s4682_s0 + $0x50] sm:$0xff] }
   0x3   :  { %v3749_v8 = vand.u32 4294901760, %v176_v3  ;;  %v3751_v9 = vand.u32 4294901760, %v173_v4  ;;  %v3753_v10 = vand.u32 4294901760, %v170_v5  ;;  %v167_v11 = vsel %vm105_vm0, %v45_v6, 0  ;;  %v42_v24 = vld [vmem:[%s4682_s0 + $0x48] sm:$0xff] }
   0x4   :  { %v3759_v13 = vand.u32 4294901760, %v167_v11  ;;  %v164_v14 = vsel %vm105_vm0, %v44_v7, 0  ;;  %v161_v19 = vsel %vm105_vm0, %v43_v12, 0  ;;  %v158_v28 = vsel %vm105_vm0, %v42_v24, 0 }
   0x5   :  { %3145 = vmatprep.subr.mxu0 %v3749_v8  ;;  %v3764_v15 = vsub.f32 %v176_v3, %v3749_v8  ;;  %v3767_v16 = vsub.f32 %v173_v4, %v3751_v9  ;;  %v3770_v17 = vsub.f32 %v170_v5, %v3753_v10  ;;  %v3773_v18 = vand.u32 4294901760, %v164_v14 }
   0x6   :  { %3146 = vmatpush3.xpose.msra.mxu0 %v3749_v8  ;;  %v3787_v23 = vsub.f32 %v167_v11, %v3759_v13  ;;  %v3797_v27 = vand.u32 4294901760, %v161_v19 }
   0x7   :  { %3147 = vmatprep.subr.mxu0 %v3751_v9  ;;  %v3778_v20 = vand.u32 4294901760, %v3764_v15  ;;  %v3781_v21 = vand.u32 4294901760, %v3767_v16  ;;  %v3784_v22 = vand.u32 4294901760, %v3770_v17  ;;  %v3801_v29 = vsub.f32 %v164_v14, %v3773_v18 }
   0x8   :  { %v3807_v33 = vand.u32 4294901760, %v3787_v23 }
   0x9   :  { %4723 = vst [vmem:[#allocation5_spill] sm:$0xff] %v3784_v22  ;;  %v343_v25 = vsub.f32 %v3764_v15, %v3778_v20  ;;  %v350_v26 = vsub.f32 %v3767_v16, %v3781_v21  ;;  %v357_v32 = vsub.f32 %v3770_v17, %v3784_v22 }
   0xa   :  { %3148 = vmatpush3.xpose.msra.mxu0 %v3751_v9  ;;  %4724 = vst [vmem:[#allocation6_spill] sm:$0xff] %v3807_v33 }
   0xb   :  { %3149 = vmatprep.subr.mxu0 %v3753_v10  ;;  %v344_v30 = vand.u32 4294901760, %v343_v25  ;;  %v351_v31 = vand.u32 4294901760, %v350_v26 }
   0xc   :  { %14 = vsyncpa [#allocation3], 0  ;;  %v41_v34 = vld [vmem:[%s4682_s0 + $0x40] sm:$0xff]  ;;  %v3813_v35 = vand.u32 4294901760, %v158_v28  ;;  %v3816_v36 = vsub.f32 %v161_v19, %v3797_v27  ;;  %v358_v37 = vand.u32 4294901760, %v357_v32  ;;  %v364_v38 = vsub.f32 %v3787_v23, %v3807_v33  ;;  %v40_v41 = vld [vmem:[%s4682_s0 + $0x38] sm:$0xff] }
   0xd   :  { %3189 = vmatprep.subr.mxu1 %v344_v30  ;;  %v3822_v39 = vand.u32 4294901760, %v3801_v29  ;;  %v155_v40 = vsel %vm105_vm0, %v41_v34, 0  ;;  %v152_v47 = vsel %vm105_vm0, %v40_v41, 0  ;;  %v49_v48 = vld [vmem:[%s4683_s1] sm:$0xff]  ;;  %v39_v49 = vld [vmem:[%s4682_s0 + $0x30] sm:$0xff]  ;;  %v38_v57 = vld [vmem:[%s4682_s0 + $0x28] sm:$0xff] }
   0xe   :  { %3150 = vmatpush3.xpose.msra.mxu0 %v3753_v10  ;;  %3190 = vmatpush3.xpose.msra.mxu1 %v344_v30  ;;  %v3830_v42 = vand.u32 4294901760, %v3816_v36  ;;  %v3833_v43 = vsub.f32 %v158_v28, %v3813_v35  ;;  %v365_v44 = vand.u32 4294901760, %v364_v38  ;;  %v3838_v46 = vand.u32 4294901760, %v155_v40  ;;  %v37_v2 = vld [vmem:[%s4682_s0 + $0x20] sm:$0xff]  ;;  %v36_v19 = vld [vmem:[%s4682_s0 + $0x18] sm:$0xff]  ;;  %v62_v30 = vld [vmem:[%s4684_s2 + $0x28] sm:$0xff] }
   0xf   :  { %3151 = vmatprep.subr.mxu0 %v3759_v13  ;;  %3191 = vmatprep.subr.mxu1 %v351_v31  ;;  %4725 = vst [vmem:[#allocation7_spill] sm:$0xff] %v3822_v39  ;;  %v371_v45 = vsub.f32 %v3801_v29, %v3822_v39  ;;  %v3850_v51 = vand.u32 4294901760, %v152_v47  ;;  %v107_v53 = vsel %vm105_vm0, %v49_v48, 0  ;;  %v149_v55 = vsel %vm105_vm0, %v39_v49, 0  ;;  %v64_v28 = vld [vmem:[%s4684_s2 + $0x38] sm:$0xff]  ;;  %v35_v38 = vld [vmem:[%s4682_s0 + $0x10] sm:$0xff] }
  0x10   :  { %4726 = vst [vmem:[#allocation8_spill] sm:$0xff] %v3830_v42  ;;  %v378_v50 = vsub.f32 %v3816_v36, %v3830_v42  ;;  %v3853_v52 = vand.u32 4294901760, %v3833_v43  ;;  %v3859_v56 = vsub.f32 %v155_v40, %v3838_v46  ;;  %v3864_v58 = vand.u32 4294901760, %v107_v53 }
  0x11   :  { %v372_v54 = vand.u32 4294901760, %v371_v45  ;;  %v3871_v61 = vand.u32 4294901760, %v149_v55  ;;  %v146_v62 = vsel %vm105_vm0, %v38_v57, 0  ;;  %v3881_v1 = vsub.f32 %v152_v47, %v3850_v51  ;;  %v63_v45 = vld [vmem:[%s4684_s2 + $0x30] sm:$0xff]  ;;  %v61_v47 = vld [vmem:[%s4684_s2 + $0x20] sm:$0xff] }
  0x12   :  { %3152 = vmatpush3.xpose.msra.mxu0 %v3759_v13  ;;  %3192 = vmatpush3.xpose.msra.mxu1 %v351_v31  ;;  %4727 = vst [vmem:[#allocation9_spill] sm:$0xff] %v3853_v52  ;;  %4728 = vst [vmem:[#allocation10_spill] sm:$0xff] %v3864_v58  ;;  %v3867_v59 = vsub.f32 %v107_v53, %v3864_v58  ;;  %v379_v60 = vand.u32 4294901760, %v378_v50  ;;  %v385_v63 = vsub.f32 %v3833_v43, %v3853_v52  ;;  %v3677_v40 = vmov 0  }
  0x13   :  { %3153 = vmatprep.subr.mxu0 %v3773_v18  ;;  %3193 = vmatprep.subr.mxu1 %v358_v37  ;;  %v3878_v0 = vand.u32 4294901760, %v3859_v56  ;;  %v3891_v5 = vand.u32 4294901760, %v146_v62  ;;  %v143_v6 = vsel %vm105_vm0, %v37_v2, 0  ;;  %v3895_v7 = vsub.f32 %v149_v55, %v3871_v61 }
  0x14   :  { %3221 = vmatprep.mubr.f32.mxu1 %v3864_v58  ;;  %v4692_v3 = vand.u32 4294901760, %v3867_v59  ;;  %v386_v11 = vand.u32 4294901760, %v385_v63  ;;  %v3901_v14 = vand.u32 4294901760, %v3881_v1  ;;  %v3907_v25 = vand.u32 4294901760, %v143_v6  ;;  %3654 = vset.pattern.permute.xlu1 %v3677_v40 }
  0x15   :  { %4729 = vst [vmem:[#allocation11_spill] sm:$0xff] %v3878_v0  ;;  %v392_v12 = vsub.f32 %v3859_v56, %v3878_v0  ;;  %v140_v26 = vsel %vm105_vm0, %v36_v19, 0  ;;  %v3920_v34 = vand.u32 4294901760, %v3895_v7  ;;  %3653 = vset.pattern.permute.xlu0 %v3677_v40  ;;  %92 = vperm.xlu1 %3654, %v62_v30   ;;  %v58_v30 = vld [vmem:[%s4684_s2 + $0x8] sm:$0xff]  ;;  %vm1156_vm1 = vcmask 523264  }
  0x16   :  { %3154 = vmatpush3.xpose.msra.mxu0 %v3773_v18  ;;  %3194 = vmatpush3.xpose.msra.mxu1 %v358_v37  ;;  %v262_v4 = vsub.f32 %v3867_v59, %v4692_v3  ;;  %4730 = vst [vmem:[#allocation12_spill] sm:$0xff] %v3901_v14  ;;  %v399_v32 = vsub.f32 %v3881_v1, %v3901_v14  ;;  %v3929_v41 = vand.u32 4294901760, %v140_v26  ;;  %vm1853_vm2 = vcmask 261120  }
  0x17   :  { %3155 = vmatprep.subr.mxu0 %v3797_v27  ;;  %3195 = vmatprep.subr.mxu1 %v365_v44  ;;  %v393_v31 = vand.u32 4294901760, %v392_v12  ;;  %4731 = vst [vmem:[#allocation13_spill] sm:$0xff] %v3920_v34  ;;  %v3923_v37 = vsub.f32 %v146_v62, %v3891_v5  ;;  %v406_v49 = vsub.f32 %v3895_v7, %v3920_v34  ;;  %v59_v62 = vld [vmem:[%s4684_s2 + $0x10] sm:$0xff]  ;;  %v50_v12 = vld [vmem:[%s4683_s1 + $0x8] sm:$0xff]  ;;  %vm3679_vm3 = vmmov 0  }
  0x18   :  { %v263_v24 = vand.u32 4294901760, %v262_v4  ;;  %102 = vperm.xlu0 %3653, %v64_v28   ;;  %v400_v48 = vand.u32 4294901760, %v399_v32  ;;  %v3945_v53 = vsub.f32 %v143_v6, %v3907_v25  ;;  %v3967_v6 = vsub.f32 %v140_v26, %v3929_v41  ;;  %v51_v28 = vld [vmem:[%s4683_s1 + $0x10] sm:$0xff] }
  0x19   :  { %v3942_v50 = vand.u32 4294901760, %v3923_v37  ;;  %87 = vperm.xlu1 %3654, %v61_v47   ;;  %v407_v63 = vand.u32 4294901760, %v406_v49  ;;  %v110_v26 = vsel %vm105_vm0, %v50_v12, 0  ;;  %v52_v47 = vld [vmem:[%s4683_s1 + $0x18] sm:$0xff]  ;;  %v113_v49 = vsel %vm105_vm0, %v51_v28, 0  ;;  %v54_v12 = vld [vmem:[%s4683_s1 + $0x28] sm:$0xff] }
  0x1a   :  { %3156 = vmatpush3.xpose.msra.mxu0 %v3797_v27  ;;  %3196 = vmatpush3.xpose.msra.mxu1 %v365_v44  ;;  %v137_v44 = vsel %vm105_vm0, %v35_v38, 0  ;;  %v3964_v4 = vand.u32 4294901760, %v3945_v53  ;;  %v3993_v40 = vand.u32 4294901760, %v3967_v6  ;;  %v4023_v28 = vand.u32 4294901760, %v113_v49 }
  0x1b   :  { %3157 = vmatprep.subr.mxu0 %v3813_v35  ;;  %3197 = vmatprep.subr.mxu1 %v372_v54  ;;  %4732 = vst [vmem:[#allocation14_spill] sm:$0xff] %v3942_v50  ;;  %v3951_v55 = vand.u32 4294901760, %v137_v44  ;;  %v413_v2 = vsub.f32 %v3923_v37, %v3942_v50  ;;  %vm2397_vm4 = vcmask 130048  }
  0x1c   :  { %3177 = vmatprep.mubr.f32.mxu0 %v263_v24  ;;  %97 = vperm.xlu0 %3653, %v63_v45   ;;  %4733 = vst [vmem:[#allocation15_spill] sm:$0xff] %v3964_v4  ;;  %v420_v38 = vsub.f32 %v3945_v53, %v3964_v4  ;;  %4734 = vst [vmem:[#allocation16_spill] sm:$0xff] %v3993_v40 }
  0x1d   :  { %77 = vperm.xlu1 %3654, %v59_v62   ;;  %v414_v32 = vand.u32 4294901760, %v413_v2  ;;  %v3996_v45 = vsub.f32 %v137_v44, %v3951_v55  ;;  %v53_v44 = vld [vmem:[%s4683_s1 + $0x20] sm:$0xff]  ;;  %v427_v2 = vsub.f32 %v3967_v6, %v3993_v40 }
  0x1e   :  { %3158 = vmatpush3.xpose.msra.mxu0 %v3813_v35  ;;  %3198 = vmatpush3.xpose.msra.mxu1 %v372_v54  ;;  %v34_v54 = vld [vmem:[%s4682_s0 + $0x8] sm:$0xff]  ;;  %v421_v62 = vand.u32 4294901760, %v420_v38  ;;  %v119_v38 = vsel %vm105_vm0, %v53_v44, 0 }
  0x1f   :  { %3159 = vmatprep.subr.mxu0 %v3838_v46  ;;  %3199 = vmatprep.subr.mxu1 %v379_v60  ;;  %v134_v57 = vsel %vm105_vm0, %v34_v54, 0  ;;  %v428_v3 = vand.u32 4294901760, %v427_v2  ;;  %v4051_v4 = vand.u32 4294901760, %v119_v38 }
  0x20   :  { %v3976_v19 = vand.u32 4294901760, %v134_v57 }
  0x21   :  { %v4070_v0 = vsub.f32 %v119_v38, %v4051_v4 }
  0x22   :  { %3160 = vmatpush3.xpose.msra.mxu0 %v3838_v46  ;;  %3200 = vmatpush3.xpose.msra.mxu1 %v379_v60  ;;  %v60_v60 = vld [vmem:[%s4684_s2 + $0x18] sm:$0xff] }
  0x23   :  { %3161 = vmatprep.subr.mxu0 %v3850_v51  ;;  %3201 = vmatprep.subr.mxu1 %v386_v11 }
  0x24   :  { %82 = vperm.xlu0 %3653, %v60_v60   ;;  %v116_v60 = vsel %vm105_vm0, %v52_v47, 0  ;;  %v122_v47 = vsel %vm105_vm0, %v54_v12, 0  ;;  %v4049_v12 = vsub.f32 %v113_v49, %v4023_v28 }
  0x26   :  { %3162 = vmatpush3.xpose.msra.mxu0 %v3850_v51  ;;  %3202 = vmatpush3.xpose.msra.mxu1 %v386_v11  ;;  %v33_v11 = vld [vmem:[%s4682_s0] sm:$0xff]  ;;  %v4739_v42 = vand.u32 4294901760, %v4049_v12 }
  0x27   :  { %3163 = vmatprep.subr.mxu0 %v3871_v61  ;;  %3203 = vmatprep.subr.mxu1 %v393_v31  ;;  %v131_v24 = vsel %vm105_vm0, %v33_v11, 0  ;;  %v4015_v11 = vand.u32 4294901760, %v3996_v45 }
  0x28   :  { %72 = vperm.xlu0 %3653, %v58_v30   ;;  %v4005_v54 = vand.u32 4294901760, %v131_v24 }
  0x29   :  { %4735 = vst [vmem:[#allocation17_spill] sm:$0xff] %v4015_v11 }
  0x2a   :  { %3164 = vmatpush3.xpose.msra.mxu0 %v3871_v61  ;;  %3204 = vmatpush3.xpose.msra.mxu1 %v393_v31  ;;  %v57_v31 = vld [vmem:[%s4684_s2] sm:$0xff]  ;;  %v4043_v44 = vsub.f32 %v131_v24, %v4005_v54 }
  0x2b   :  { %3165 = vmatprep.subr.mxu0 %v3891_v5  ;;  %3205 = vmatprep.subr.mxu1 %v400_v48 }
  0x2c   :  { %67 = vperm.xlu1 %3654, %v57_v31   ;;  %v4028_v31 = vand.u32 4294901760, %v116_v60  ;;  %v4066_v2 = vand.u32 4294901760, %v4043_v44 }
  0x2e   :  { %3166 = vmatpush3.xpose.msra.mxu0 %v3891_v5  ;;  %3206 = vmatpush3.xpose.msra.mxu1 %v400_v48  ;;  %v4001_v48 = vand.u32 4294901760, %v110_v26  ;;  %v4055_v50 = vsub.f32 %v116_v60, %v4028_v31  ;;  %4737 = vst [vmem:[#allocation19_spill] sm:$0xff] %v4066_v2  ;;  %v448_v60 = vsub.f32 %v4043_v44, %v4066_v2 }
  0x2f   :  { %3167 = vmatprep.subr.mxu0 %v3907_v25  ;;  %3207 = vmatprep.subr.mxu1 %v407_v63 }
  0x30   :  { %v4026_v30 = vsub.f32 %v110_v26, %v4001_v48  ;;  %v434_v26 = vsub.f32 %v3996_v45, %v4015_v11  ;;  %v4057_v11 = vand.u32 4294901760, %v122_v47  ;;  %v4740_v39 = vand.u32 4294901760, %v4055_v50 }
  0x32   :  { %3168 = vmatpush3.xpose.msra.mxu0 %v3907_v25  ;;  %3208 = vmatpush3.xpose.msra.mxu1 %v407_v63  ;;  %v4018_v63 = vsub.f32 %v134_v57, %v3976_v19  ;;  %v55_v57 = vld [vmem:[%s4683_s1 + $0x30] sm:$0xff]  ;;  %v435_v49 = vand.u32 4294901760, %v434_v26  ;;  %v4079_v26 = vsub.f32 %v122_v47, %v4057_v11 }
  0x33   :  { %3169 = vmatprep.subr.mxu0 %v3929_v41  ;;  %3209 = vmatprep.subr.mxu1 %v414_v32  ;;  %v125_v34 = vsel %vm105_vm0, %v55_v57, 0 }
  0x34   :  { %v4040_v40 = vand.u32 4294901760, %v4018_v63  ;;  %v4072_v57 = vand.u32 4294901760, %v125_v34  ;;  %v311_v33 = vand.u32 4294901760, %v4079_v26 }
  0x36   :  { %3170 = vmatpush3.xpose.msra.mxu0 %v3929_v41  ;;  %3210 = vmatpush3.xpose.msra.mxu1 %v414_v32  ;;  %4736 = vst [vmem:[#allocation18_spill] sm:$0xff] %v4040_v40  ;;  %v56_v32 = vld [vmem:[%s4683_s1 + $0x38] sm:$0xff]  ;;  %v441_v14 = vsub.f32 %v4018_v63, %v4040_v40  ;;  %v4092_v47 = vsub.f32 %v125_v34, %v4072_v57  ;;  %v4741_v34 = vand.u32 4294901760, %v4070_v0 }
  0x37   :  { %3171 = vmatprep.subr.mxu0 %v3951_v55  ;;  %3211 = vmatprep.subr.mxu1 %v421_v62  ;;  %v128_v24 = vsel %vm105_vm0, %v56_v32, 0 }
  0x38   :  { %v4081_v40 = vand.u32 4294901760, %v128_v24  ;;  %v442_v38 = vand.u32 4294901760, %v441_v14  ;;  %v321_v2 = vand.u32 4294901760, %v4092_v47 }
  0x3a   :  { %3172 = vmatpush3.xpose.msra.mxu0 %v3951_v55  ;;  %3212 = vmatpush3.xpose.msra.mxu1 %v421_v62  ;;  %v4738_v62 = vand.u32 4294901760, %v4026_v30  ;;  %v4099_v14 = vsub.f32 %v128_v24, %v4081_v40  ;;  %v312_v24 = vsub.f32 %v4079_v26, %v311_v33 }
  0x3b   :  { %3173 = vmatprep.subr.mxu0 %v3976_v19  ;;  %3213 = vmatprep.subr.mxu1 %v428_v3 }
  0x3c   :  { %v272_v32 = vsub.f32 %v4026_v30, %v4738_v62  ;;  %v282_v62 = vsub.f32 %v4049_v12, %v4739_v42  ;;  %v449_v42 = vand.u32 4294901760, %v448_v60  ;;  %v331_v22 = vand.u32 4294901760, %v4099_v14 }
  0x3d   :  { %v322_v60 = vsub.f32 %v4092_v47, %v321_v2 }
  0x3e   :  { %3174 = vmatpush3.xpose.msra.mxu0 %v3976_v19  ;;  %3214 = vmatpush3.xpose.msra.mxu1 %v428_v3  ;;  %v273_v58 = vand.u32 4294901760, %v272_v32  ;;  %v292_v3 = vsub.f32 %v4055_v50, %v4740_v39  ;;  %v283_v52 = vand.u32 4294901760, %v282_v62  ;;  %v302_v32 = vsub.f32 %v4070_v0, %v4741_v34 }
  0x3f   :  { %3175 = vmatprep.subr.mxu0 %v4005_v54  ;;  %3215 = vmatprep.subr.mxu1 %v435_v49  ;;  %v332_v62 = vsub.f32 %v4099_v14, %v331_v22 }
  0x40   :  { %v293_v39 = vand.u32 4294901760, %v292_v3 }
  0x42   :  { %3176 = vmatpush3.xpose.msra.mxu0 %v4005_v54  ;;  %3216 = vmatpush3.xpose.msra.mxu1 %v435_v49  ;;  %v303_v49 = vand.u32 4294901760, %v302_v32 }
  0x43   :  { %3217 = vmatprep.subr.mxu1 %v442_v38  ;;  %3233 = vmatprep.subr.mxu0 %v3764_v15 }
  0x45   :  { %3178 = vmatmul.mubr.f32.vlgmr.msra.gmra.mxu0 %v273_v58  ;;  %v313_v58 = vand.u32 4294901760, %v312_v24 }
  0x46   :  { %3218 = vmatpush3.xpose.msra.mxu1 %v442_v38  ;;  %3234 = vmatpush3.xpose.msra.mxu0 %v3764_v15  ;;  %v323_v15 = vand.u32 4294901760, %v322_v60 }
  0x47   :  { %3219 = vmatprep.subr.mxu1 %v449_v42  ;;  %3235 = vmatprep.subr.mxu0 %v3767_v16 }
  0x48   :  { %3180 = vmatprep.mubr.f32.mxu0 %v283_v52  ;;  %v333_v52 = vand.u32 4294901760, %v332_v62 }
  0x49   :  { %3181 = vmatmul.mubr.f32.gmra.mxu0 %v293_v39 }
  0x4a   :  { %3220 = vmatpush3.xpose.msra.mxu1 %v449_v42  ;;  %3236 = vmatpush3.xpose.msra.mxu0 %v3767_v16  ;;  %v1135_v16 = vld [vmem:[%s4686_s4 + $0x18] sm:$0xff] }
  0x4b   :  { %3237 = vmatprep.subr.mxu0 %v3770_v17  ;;  %3277 = vmatprep.subr.mxu1 %v3749_v8 }
  0x4c   :  { %3183 = vmatprep.mubr.f32.mxu0 %v303_v49  ;;  %1153 = vperm.xlu0 %3653, %v1135_v16  }
  0x4d   :  { %3222 = vmatmul.mubr.f32.vlgmr.msra.gmra.mxu1 %v4001_v48  ;;  %3184 = vmatmul.mubr.f32.gmra.mxu0 %v313_v58 }
  0x4e   :  { %3238 = vmatpush3.xpose.msra.mxu0 %v3770_v17  ;;  %3278 = vmatpush3.xpose.msra.mxu1 %v3749_v8  ;;  %v4742_v17 = vand.u32 4294901760, %v3867_v59 }
  0x4f   :  { %3239 = vmatprep.subr.mxu0 %v3787_v23  ;;  %3279 = vmatprep.subr.mxu1 %v3751_v9 }
  0x50   :  { %3224 = vmatprep.mubr.f32.mxu1 %v4023_v28  ;;  %3186 = vmatprep.mubr.f32.mxu0 %v323_v15 }
  0x51   :  { %3225 = vmatmul.mubr.f32.gmra.mxu1 %v4028_v31  ;;  %3187 = vmatmul.mubr.f32.gmra.mxu0 %v333_v52 }
  0x52   :  { %3240 = vmatpush3.xpose.msra.mxu0 %v3787_v23  ;;  %3280 = vmatpush3.xpose.msra.mxu1 %v3751_v9  ;;  %v1133_v23 = vld [vmem:[%s4686_s4 + $0x8] sm:$0xff] }
  0x53   :  { %3241 = vmatprep.subr.mxu0 %v3801_v29  ;;  %3281 = vmatprep.subr.mxu1 %v3753_v10 }
  0x54   :  { %3227 = vmatprep.mubr.f32.mxu1 %v4051_v4  ;;  %3265 = vmatprep.mubr.f32.mxu0 %v3867_v59  ;;  %v4749_v59 = vld [vmem:[#allocation7_spill] sm:$0xff] }
  0x55   :  { %3228 = vmatmul.mubr.f32.gmra.mxu1 %v4057_v11  ;;  %1143 = vperm.xlu0 %3653, %v1133_v23  }
  0x56   :  { %3242 = vmatpush3.xpose.msra.mxu0 %v3801_v29  ;;  %3282 = vmatpush3.xpose.msra.mxu1 %v3753_v10  ;;  %v4743_v29 = vld [vmem:[#allocation5_spill] sm:$0xff] }
  0x57   :  { %3243 = vmatprep.subr.mxu0 %v3816_v36  ;;  %3283 = vmatprep.subr.mxu1 %v3759_v13 }
  0x58   :  { %3230 = vmatprep.mubr.f32.mxu1 %v4072_v57 }
  0x59   :  { %3231 = vmatmul.mubr.f32.gmra.mxu1 %v4081_v40 }
  0x5a   :  { %3244 = vmatpush3.xpose.msra.mxu0 %v3816_v36  ;;  %3284 = vmatpush3.xpose.msra.mxu1 %v3759_v13  ;;  %v4745_v36 = vand.u32 4294901760, %v4049_v12 }
  0x5b   :  { %3245 = vmatprep.subr.mxu0 %v3833_v43  ;;  %3285 = vmatprep.subr.mxu1 %v3773_v18 }
  0x5c   :  { %3309 = vmatprep.mubr.f32.mxu1 %v4742_v17 }
  0x5e   :  { %3246 = vmatpush3.xpose.msra.mxu0 %v3833_v43  ;;  %3286 = vmatpush3.xpose.msra.mxu1 %v3773_v18  ;;  %v4747_v43 = vand.u32 4294901760, %v4055_v50 }
  0x5f   :  { %3247 = vmatprep.subr.mxu0 %v3859_v56  ;;  %3287 = vmatprep.subr.mxu1 %v3797_v27 }
  0x62   :  { %3248 = vmatpush3.xpose.msra.mxu0 %v3859_v56  ;;  %3288 = vmatpush3.xpose.msra.mxu1 %v3797_v27  ;;  %v4748_v56 = vmov %v4741_v34 }
  0x63   :  { %3249 = vmatprep.subr.mxu0 %v3881_v1  ;;  %3289 = vmatprep.subr.mxu1 %v3813_v35 }
  0x66   :  { %3250 = vmatpush3.xpose.msra.mxu0 %v3881_v1  ;;  %3290 = vmatpush3.xpose.msra.mxu1 %v3813_v35  ;;  %v4750_v1 = vld [vmem:[#allocation10_spill] sm:$0xff] }
  0x67   :  { %3251 = vmatprep.subr.mxu0 %v3895_v7  ;;  %3291 = vmatprep.subr.mxu1 %v3838_v46 }
  0x6a   :  { %3252 = vmatpush3.xpose.msra.mxu0 %v3895_v7  ;;  %3292 = vmatpush3.xpose.msra.mxu1 %v3838_v46  ;;  %v4751_v7 = vld [vmem:[#allocation8_spill] sm:$0xff] }
  0x6b   :  { %3253 = vmatprep.subr.mxu0 %v3923_v37  ;;  %3293 = vmatprep.subr.mxu1 %v3850_v51 }
  0x6e   :  { %3254 = vmatpush3.xpose.msra.mxu0 %v3923_v37  ;;  %3294 = vmatpush3.xpose.msra.mxu1 %v3850_v51  ;;  %v4753_v37 = vld [vmem:[#allocation11_spill] sm:$0xff] }
  0x6f   :  { %3255 = vmatprep.subr.mxu0 %v3945_v53  ;;  %3295 = vmatprep.subr.mxu1 %v3871_v61 }
  0x72   :  { %3256 = vmatpush3.xpose.msra.mxu0 %v3945_v53  ;;  %3296 = vmatpush3.xpose.msra.mxu1 %v3871_v61 }
  0x73   :  { %3257 = vmatprep.subr.mxu0 %v3967_v6  ;;  %3297 = vmatprep.subr.mxu1 %v3891_v5 }
  0x76   :  { %3258 = vmatpush3.xpose.msra.mxu0 %v3967_v6  ;;  %3298 = vmatpush3.xpose.msra.mxu1 %v3891_v5 }
  0x77   :  { %3259 = vmatprep.subr.mxu0 %v3996_v45  ;;  %3299 = vmatprep.subr.mxu1 %v3907_v25 }
  0x7a   :  { %3260 = vmatpush3.xpose.msra.mxu0 %v3996_v45  ;;  %3300 = vmatpush3.xpose.msra.mxu1 %v3907_v25 }
  0x7b   :  { %3261 = vmatprep.subr.mxu0 %v4018_v63  ;;  %3301 = vmatprep.subr.mxu1 %v3929_v41 }
  0x7e   :  { %3262 = vmatpush3.xpose.msra.mxu0 %v4018_v63  ;;  %3302 = vmatpush3.xpose.msra.mxu1 %v3929_v41 }
  0x7f   :  { %3263 = vmatprep.subr.mxu0 %v4043_v44  ;;  %3303 = vmatprep.subr.mxu1 %v3951_v55 }
  0x82   :  { %3264 = vmatpush3.xpose.msra.mxu0 %v4043_v44  ;;  %3304 = vmatpush3.xpose.msra.mxu1 %v3951_v55 }
  0x83   :  { %3305 = vmatprep.subr.mxu1 %v3976_v19  ;;  %3321 = vmatprep.subr.mxu0 %v3778_v20 }
  0x85   :  { %3266 = vmatmul.mubr.f32.vlgmr.msra.gmra.mxu0 %v4026_v30 }
  0x86   :  { %3306 = vmatpush3.xpose.msra.mxu1 %v3976_v19  ;;  %3322 = vmatpush3.xpose.msra.mxu0 %v3778_v20  ;;  %v4744_v20 = vand.u32 4294901760, %v4026_v30 }
  0x87   :  { %3268 = vmatprep.mubr.f32.mxu0 %v4049_v12  ;;  %3307 = vmatprep.subr.mxu1 %v4005_v54 }
  0x88   :  { %3323 = vmatprep.subr.mxu0 %v3781_v21 }
  0x89   :  { %3269 = vmatmul.mubr.f32.gmra.mxu0 %v4055_v50  ;;  %v4755_v50 = vld [vmem:[#allocation13_spill] sm:$0xff] }
  0x8a   :  { %3308 = vmatpush3.xpose.msra.mxu1 %v4005_v54  ;;  %3324 = vmatpush3.xpose.msra.mxu0 %v3781_v21  ;;  %v4746_v21 = vld [vmem:[#allocation6_spill] sm:$0xff] }
  0x8b   :  { %3271 = vmatprep.mubr.f32.mxu0 %v4070_v0  ;;  %3325 = vmatprep.subr.mxu0 %v4743_v29  ;;  %v2391_v0 = vld [vmem:[%s4690_s8] sm:$0x3] }
  0x8c   :  { %3365 = vmatprep.subr.mxu1 %v3749_v8 }
  0x8d   :  { %3272 = vmatmul.mubr.f32.gmra.mxu0 %v4079_v26  ;;  %3310 = vmatmul.mubr.f32.vlgmr.msra.gmra.mxu1 %v4744_v20 }
  0x8e   :  { %3326 = vmatpush3.xpose.msra.mxu0 %v4743_v29  ;;  %3366 = vmatpush3.xpose.msra.mxu1 %v3749_v8  ;;  %v1842_v8 = vld [vmem:[%s4688_s6 + $0x8] sm:$0xff] }
  0x8f   :  { %3274 = vmatprep.mubr.f32.mxu0 %v4092_v47  ;;  %3312 = vmatprep.mubr.f32.mxu1 %v4745_v36 }
  0x90   :  { %3327 = vmatprep.subr.mxu0 %v4746_v21  ;;  %3367 = vmatprep.subr.mxu1 %v3751_v9  ;;  %v93_v62 = vpop.permute.xlu1 %92 }
  0x91   :  { %3275 = vmatmul.mubr.f32.gmra.mxu0 %v4099_v14  ;;  %3313 = vmatmul.mubr.f32.gmra.mxu1 %v4747_v43 }
  0x92   :  { %3328 = vmatpush3.xpose.msra.mxu0 %v4746_v21  ;;  %3368 = vmatpush3.xpose.msra.mxu1 %v3751_v9  ;;  %v1134_v9 = vld [vmem:[%s4686_s4 + $0x10] sm:$0xff] }
  0x93   :  { %3315 = vmatprep.mubr.f32.mxu1 %v4748_v56  ;;  %3329 = vmatprep.subr.mxu0 %v4749_v59  ;;  %v103_v49 = vpop.permute.xlu0 %102 }
  0x94   :  { %3369 = vmatprep.subr.mxu1 %v3753_v10  ;;  %3353 = vmatprep.mubr.f32.mxu0 %v4750_v1  ;;  %v88_v17 = vpop.permute.xlu1 %87 }
  0x95   :  { %3316 = vmatmul.mubr.f32.gmra.mxu1 %v311_v33  ;;  %1850 = vperm.xlu0 %3653, %v1842_v8   ;;  %v4752_v33 = vld [vmem:[#allocation9_spill] sm:$0xff] }
  0x96   :  { %3330 = vmatpush3.xpose.msra.mxu0 %v4749_v59  ;;  %3370 = vmatpush3.xpose.msra.mxu1 %v3753_v10  ;;  %v1132_v10 = vld [vmem:[%s4686_s4] sm:$0xff] }
  0x97   :  { %3318 = vmatprep.mubr.f32.mxu1 %v321_v2  ;;  %3331 = vmatprep.subr.mxu0 %v4751_v7  ;;  %v98_v16 = vpop.permute.xlu0 %97 }
  0x98   :  { %3371 = vmatprep.subr.mxu1 %v3759_v13  ;;  %1148 = vperm.xlu1 %3654, %v1134_v9   ;;  %v78_v8 = vpop.permute.xlu1 %77 }
  0x99   :  { %3319 = vmatmul.mubr.f32.gmra.mxu1 %v331_v22  ;;  %2394 = vperm.xlu0 %3653, %v2391_v0   ;;  %v1841_v22 = vld [vmem:[%s4688_s6] sm:$0xff] }
  0x9a   :  { %3332 = vmatpush3.xpose.msra.mxu0 %v4751_v7  ;;  %3372 = vmatpush3.xpose.msra.mxu1 %v3759_v13  ;;  %v4754_v13 = vld [vmem:[#allocation12_spill] sm:$0xff] }
  0x9b   :  { %3333 = vmatprep.subr.mxu0 %v4752_v33  ;;  %3373 = vmatprep.subr.mxu1 %v3773_v18 }
  0x9c   :  { %3397 = vmatprep.mubr.f32.mxu1 %v4750_v1  ;;  %1138 = vperm.xlu1 %3654, %v1132_v10  }
  0x9e   :  { %3334 = vmatpush3.xpose.msra.mxu0 %v4752_v33  ;;  %3374 = vmatpush3.xpose.msra.mxu1 %v3773_v18  ;;  %v4756_v18 = vld [vmem:[#allocation14_spill] sm:$0xff] }
  0x9f   :  { %3335 = vmatprep.subr.mxu0 %v4753_v37  ;;  %3375 = vmatprep.subr.mxu1 %v3797_v27  ;;  %v83_v36 = vpop.permute.xlu0 %82 }
  0xa0   :  { %1845 = vperm.xlu1 %3654, %v1841_v22  }
  0xa2   :  { %3336 = vmatpush3.xpose.msra.mxu0 %v4753_v37  ;;  %3376 = vmatpush3.xpose.msra.mxu1 %v3797_v27  ;;  %v4757_v27 = vld [vmem:[#allocation15_spill] sm:$0xff] }
  0xa3   :  { %3337 = vmatprep.subr.mxu0 %v4754_v13  ;;  %3377 = vmatprep.subr.mxu1 %v3813_v35  ;;  %v73_v7 = vpop.permute.xlu0 %72 }
  0xa6   :  { %3338 = vmatpush3.xpose.msra.mxu0 %v4754_v13  ;;  %3378 = vmatpush3.xpose.msra.mxu1 %v3813_v35  ;;  %v4758_v35 = vld [vmem:[#allocation16_spill] sm:$0xff] }
  0xa7   :  { %3339 = vmatprep.subr.mxu0 %v4755_v50  ;;  %3379 = vmatprep.subr.mxu1 %v3838_v46 }
  0xaa   :  { %3340 = vmatpush3.xpose.msra.mxu0 %v4755_v50  ;;  %3380 = vmatpush3.xpose.msra.mxu1 %v3838_v46  ;;  %v4759_v46 = vld [vmem:[#allocation17_spill] sm:$0xff]  ;;  %v68_v50 = vpop.permute.xlu1 %67 }
  0xab   :  { %3341 = vmatprep.subr.mxu0 %v4756_v18  ;;  %3381 = vmatprep.subr.mxu1 %v3850_v51 }
  0xae   :  { %3342 = vmatpush3.xpose.msra.mxu0 %v4756_v18  ;;  %3382 = vmatpush3.xpose.msra.mxu1 %v3850_v51  ;;  %v4760_v51 = vld [vmem:[#allocation18_spill] sm:$0xff] }
  0xaf   :  { %3343 = vmatprep.subr.mxu0 %v4757_v27  ;;  %3383 = vmatprep.subr.mxu1 %v3871_v61 }
  0xb2   :  { %3344 = vmatpush3.xpose.msra.mxu0 %v4757_v27  ;;  %3384 = vmatpush3.xpose.msra.mxu1 %v3871_v61  ;;  %v4761_v61 = vld [vmem:[#allocation19_spill] sm:$0xff] }
  0xb3   :  { %3345 = vmatprep.subr.mxu0 %v4758_v35  ;;  %3385 = vmatprep.subr.mxu1 %v3891_v5 }
  0xb6   :  { %3346 = vmatpush3.xpose.msra.mxu0 %v4758_v35  ;;  %3386 = vmatpush3.xpose.msra.mxu1 %v3891_v5  ;;  %v1128_v5 = vld [vmem:[%s4685_s3] sm:$0xff] }
  0xb7   :  { %3347 = vmatprep.subr.mxu0 %v4759_v46  ;;  %3387 = vmatprep.subr.mxu1 %v3907_v25 }
  0xba   :  { %3348 = vmatpush3.xpose.msra.mxu0 %v4759_v46  ;;  %3388 = vmatpush3.xpose.msra.mxu1 %v3907_v25  ;;  %v1158_v25 = vsel %vm1156_vm1, %v1128_v5, 0 }
  0xbb   :  { %3349 = vmatprep.subr.mxu0 %v4760_v51  ;;  %3389 = vmatprep.subr.mxu1 %v3929_v41 }
  0xbe   :  { %3350 = vmatpush3.xpose.msra.mxu0 %v4760_v51  ;;  %3390 = vmatpush3.xpose.msra.mxu1 %v3929_v41  ;;  %v4316_v41 = vand.u32 4294901760, %v1158_v25 }
  0xbf   :  { %3351 = vmatprep.subr.mxu0 %v4761_v61  ;;  %3391 = vmatprep.subr.mxu1 %v3951_v55 }
  0xc0   :  { %v4319_v53 = vsub.f32 %v1158_v25, %v4316_v41 }
  0xc2   :  { %3352 = vmatpush3.xpose.msra.mxu0 %v4761_v61  ;;  %3392 = vmatpush3.xpose.msra.mxu1 %v3951_v55  ;;  %v1244_v55 = vand.u32 4294901760, %v4319_v53 }
  0xc3   :  { %3393 = vmatprep.subr.mxu1 %v3976_v19 }
  0xc5   :  { %3354 = vmatmul.mubr.f32.vlgmr.msra.gmra.mxu0 %v4001_v48 }
  0xc6   :  { %3394 = vmatpush3.xpose.msra.mxu1 %v3976_v19  ;;  %3356 = vmatprep.mubr.f32.mxu0 %v4023_v28 }
  0xc7   :  { %3395 = vmatprep.subr.mxu1 %v4005_v54 }
  0xc9   :  { %3357 = vmatmul.mubr.f32.gmra.mxu0 %v4028_v31 }
  0xca   :  { %3396 = vmatpush3.xpose.msra.mxu1 %v4005_v54  ;;  %3359 = vmatprep.mubr.f32.mxu0 %v4051_v4 }
  0xcd   :  { %3360 = vmatmul.mubr.f32.gmra.mxu0 %v4057_v11  ;;  %3398 = vmatmul.mubr.f32.vlgmr.msra.gmra.mxu1 %v4001_v48 }
  0xce   :  { %3362 = vmatprep.mubr.f32.mxu0 %v4072_v57  ;;  %3400 = vmatprep.mubr.f32.mxu1 %v4023_v28 }
  0xd1   :  { %3363 = vmatmul.mubr.f32.gmra.mxu0 %v4081_v40  ;;  %3401 = vmatmul.mubr.f32.gmra.mxu1 %v4028_v31 }
  0xd2   :  { %3403 = vmatprep.mubr.f32.mxu1 %v4051_v4  ;;  %v1245_v4 = vsub.f32 %v4319_v53, %v1244_v55 }
  0xd4   :  { %v1246_v6 = vand.u32 4294901760, %v1245_v4 }
  0xd5   :  { %3404 = vmatmul.mubr.f32.gmra.mxu1 %v4057_v11 }
  0xd6   :  { %3406 = vmatprep.mubr.f32.mxu1 %v4072_v57  ;;  %3425 = vmatprep.mubr.f32.mxu0 %v1246_v6 }
  0xd9   :  { %3407 = vmatmul.mubr.f32.gmra.mxu1 %v4081_v40 }
  0xda   :  { %3447 = vmatprep.mubr.f32.mxu1 %v4316_v41 }
 0x105   :  { %v3179_v19 = vpop.f32.mrf.mxu0 }
 0x106   :  { %v276_v35 = vadd.f32 %v3179_v19, %v73_v7 }
 0x107   :  { %v265_v40 = vpop.f32.mrf.mxu0 }
 0x109   :  { %v3182_v45 = vpop.f32.mrf.mxu0 }
 0x10a   :  { %v296_v56 = vadd.f32 %v3182_v45, %v83_v36  ;;  %v266_v45 = vadd.f32 %v265_v40, %v68_v50  ;;  %v1129_v40 = vld [vmem:[%s4685_s3 + $0x8] sm:$0xff] }
 0x10b   :  { %v285_v54 = vpop.f32.mrf.mxu0 }
 0x10c   :  { %v286_v10 = vadd.f32 %v285_v54, %v78_v8 }
 0x10d   :  { %v4326_v48 = vpop.f32.mrf.mxu1  ;;  %v3185_v63 = vpop.f32.mrf.mxu0 }
 0x10e   :  { %v316_v1 = vadd.f32 %v3185_v63, %v93_v62 }
 0x10f   :  { %v4328_v11 = vpop.f32.mrf.mxu1  ;;  %v305_v30 = vpop.f32.mrf.mxu0 }
 0x110   :  { %v306_v33 = vadd.f32 %v305_v30, %v88_v17  ;;  %v493_v17 = vadd.f32 %v4326_v48, %v276_v35 }
 0x111   :  { %v3226_v28 = vpop.f32.mrf.mxu1  ;;  %v3188_v44 = vpop.f32.mrf.mxu0 }
 0x112   :  { %v505_v22 = vadd.f32 %v3226_v28, %v296_v56  ;;  %v336_v18 = vadd.f32 %v3188_v44, %v103_v49 }
 0x113   :  { %v498_v31 = vpop.f32.mrf.mxu1  ;;  %v325_v2 = vpop.f32.mrf.mxu0 }
 0x114   :  { %v326_v46 = vadd.f32 %v325_v2, %v98_v16  ;;  %v499_v25 = vadd.f32 %v498_v31, %v286_v10  ;;  %v487_v31 = vadd.f32 %v4328_v11, %v266_v45 }
 0x115   :  { %v3229_v12 = vpop.f32.mrf.mxu1 }
 0x116   :  { %v517_v27 = vadd.f32 %v3229_v12, %v316_v1 }
 0x117   :  { %v510_v57 = vpop.f32.mrf.mxu1 }
 0x118   :  { %v511_v4 = vadd.f32 %v510_v57, %v306_v33 }
 0x119   :  { %v3232_v38 = vpop.f32.mrf.mxu1 }
 0x11a   :  { %v529_v36 = vadd.f32 %v3232_v38, %v336_v18 }
 0x11b   :  { %v522_v3 = vpop.f32.mrf.mxu1 }
 0x11c   :  { %v523_v8 = vadd.f32 %v522_v3, %v326_v46 }
 0x145   :  { %v4330_v26 = vpop.f32.mrf.mxu0 }
 0x146   :  { %v640_v57 = vadd.f32 %v4330_v26, %v493_v17 }
 0x147   :  { %v4332_v47 = vpop.f32.mrf.mxu0 }
 0x149   :  { %v3270_v14 = vpop.f32.mrf.mxu0 }
 0x14a   :  { %v654_v51 = vadd.f32 %v3270_v14, %v505_v22 }
 0x14b   :  { %v646_v34 = vpop.f32.mrf.mxu0 }
 0x14c   :  { %v647_v54 = vadd.f32 %v646_v34, %v499_v25 }
 0x14d   :  { %v4334_v42 = vpop.f32.mrf.mxu1  ;;  %v3273_v39 = vpop.f32.mrf.mxu0 }
 0x14e   :  { %v668_v6 = vadd.f32 %v3273_v39, %v517_v27 }
 0x14f   :  { %v4336_v32 = vpop.f32.mrf.mxu1  ;;  %v660_v60 = vpop.f32.mrf.mxu0 }
 0x150   :  { %v661_v30 = vadd.f32 %v660_v60, %v511_v4 }
 0x151   :  { %v3314_v24 = vpop.f32.mrf.mxu1  ;;  %v3276_v15 = vpop.f32.mrf.mxu0 }
 0x152   :  { %v795_v63 = vadd.f32 %v3314_v24, %v654_v51  ;;  %v682_v2 = vadd.f32 %v3276_v15, %v529_v36  ;;  %v633_v15 = vadd.f32 %v4332_v47, %v487_v31 }
 0x153   :  { %v786_v58 = vpop.f32.mrf.mxu1  ;;  %v674_v23 = vpop.f32.mrf.mxu0 }
 0x154   :  { %v787_v14 = vadd.f32 %v786_v58, %v647_v54  ;;  %v675_v38 = vadd.f32 %v674_v23, %v523_v8  ;;  %v779_v58 = vadd.f32 %v4334_v42, %v640_v57  ;;  %v1130_v23 = vld [vmem:[%s4685_s3 + $0x10] sm:$0xff] }
 0x155   :  { %v3317_v52 = vpop.f32.mrf.mxu1 }
 0x156   :  { %v811_v28 = vadd.f32 %v3317_v52, %v668_v6 }
 0x157   :  { %v802_v29 = vpop.f32.mrf.mxu1 }
 0x158   :  { %v803_v49 = vadd.f32 %v802_v29, %v661_v30 }
 0x159   :  { %v3320_v21 = vpop.f32.mrf.mxu1 }
 0x15a   :  { %v827_v48 = vadd.f32 %v3320_v21, %v682_v2  ;;  %v771_v21 = vadd.f32 %v4336_v32, %v633_v15  ;;  %v1164_v32 = vsel %vm1156_vm1, %v1130_v23, 0 }
 0x15b   :  { %v818_v9 = vpop.f32.mrf.mxu1  ;;  %v4378_v36 = vand.u32 4294901760, %v1164_v32 }
 0x15c   :  { %v819_v52 = vadd.f32 %v818_v9, %v675_v38 }
 0x185   :  { %v4338_v20 = vpop.f32.mrf.mxu0 }
 0x187   :  { %v4340_v43 = vpop.f32.mrf.mxu0 }
 0x188   :  { %v946_v50 = vadd.f32 %v4340_v43, %v771_v21 }
 0x189   :  { %v3358_v59 = vpop.f32.mrf.mxu0 }
 0x18a   :  { %v964_v44 = vadd.f32 %v3358_v59, %v795_v63  ;;  %v1161_v59 = vsel %vm1156_vm1, %v1129_v40, 0 }
 0x18b   :  { %v957_v0 = vpop.f32.mrf.mxu0  ;;  %v4362_v35 = vand.u32 4294901760, %v1161_v59 }
 0x18c   :  { %v958_v3 = vadd.f32 %v957_v0, %v787_v14  ;;  %v952_v0 = vadd.f32 %v4338_v20, %v779_v58 }
 0x18d   :  { %v3361_v37 = vpop.f32.mrf.mxu0  ;;  %v3399_v13 = vpop.f32.mrf.mxu1 }
 0x18e   :  { %v976_v16 = vadd.f32 %v3361_v37, %v811_v28  ;;  %v1131_v37 = vld [vmem:[%s4685_s3 + $0x18] sm:$0xff]  ;;  %v1081_v18 = vadd.f32 %v3399_v13, %v952_v0 }
 0x18f   :  { %v969_v61 = vpop.f32.mrf.mxu0  ;;  %v1074_v5 = vpop.f32.mrf.mxu1  ;;  %v1167_v4 = vsel %vm1156_vm1, %v1131_v37, 0 }
 0x190   :  { %v970_v24 = vadd.f32 %v969_v61, %v803_v49  ;;  %v1075_v25 = vadd.f32 %v1074_v5, %v946_v50  ;;  %v1121_v63 = vmax.f32 %v1081_v18, 0.0  ;;  %v4392_v8 = vand.u32 4294901760, %v1167_v4 }
 0x191   :  { %v3402_v62 = vpop.f32.mrf.mxu1  ;;  %v3364_v12 = vpop.f32.mrf.mxu0 }
 0x192   :  { %v1093_v34 = vadd.f32 %v3402_v62, %v964_v44  ;;  %v988_v1 = vadd.f32 %v3364_v12, %v827_v48  ;;  %v4376_v62 = vsub.f32 %v1161_v59, %v4362_v35  ;;  %v1120_v17 = vmax.f32 %v1075_v25, 0.0 }
 0x193   :  { %v1086_v19 = vpop.f32.mrf.mxu1  ;;  %v981_v29 = vpop.f32.mrf.mxu0  ;;  %v4407_v14 = vand.u32 4294901760, %v1121_v63 }
 0x194   :  { %v1087_v11 = vadd.f32 %v1086_v19, %v958_v3  ;;  %v1123_v47 = vmax.f32 %v1093_v34, 0.0  ;;  %v982_v42 = vadd.f32 %v981_v29, %v819_v52  ;;  %v1254_v49 = vand.u32 4294901760, %v4376_v62 }
 0x195   :  { %v3405_v39 = vpop.f32.mrf.mxu1  ;;  %v4426_v34 = vand.u32 4294901760, %v1120_v17  ;;  %v4441_v15 = vsub.f32 %v1121_v63, %v4407_v14 }
 0x196   :  { %v1105_v60 = vadd.f32 %v3405_v39, %v976_v16  ;;  %v1122_v20 = vmax.f32 %v1087_v11, 0.0  ;;  %v4368_v6 = vand.u32 4294901760, %v1123_v47  ;;  %v4412_v16 = vsub.f32 %v1164_v32, %v4378_v36 }
 0x197   :  { %v1098_v56 = vpop.f32.mrf.mxu1  ;;  %v4430_v39 = vsub.f32 %v1167_v4, %v4392_v8  ;;  %v4467_v21 = vand.u32 4294901760, %v4441_v15 }
 0x198   :  { %v1125_v7 = vmax.f32 %v1105_v60, 0.0  ;;  %v1099_v26 = vadd.f32 %v1098_v56, %v970_v24  ;;  %v4380_v54 = vand.u32 4294901760, %v1122_v20  ;;  %v4395_v44 = vsub.f32 %v1123_v47, %v4368_v6 }
 0x199   :  { %v3408_v10 = vpop.f32.mrf.mxu1  ;;  %v1264_v58 = vand.u32 4294901760, %v4412_v16  ;;  %v1255_v56 = vsub.f32 %v4376_v62, %v1254_v49  ;;  %v1274_v11 = vand.u32 4294901760, %v4430_v39  ;;  %v1344_v50 = vsub.f32 %v4441_v15, %v4467_v21 }
 0x19a   :  { %v4356_v9 = vand.u32 4294901760, %v1125_v7  ;;  %v1124_v33 = vmax.f32 %v1099_v26, 0.0  ;;  %v1117_v22 = vadd.f32 %v3408_v10, %v988_v1  ;;  %v4415_v40 = vsub.f32 %v1122_v20, %v4380_v54 }
 0x19b   :  { %v1110_v27 = vpop.f32.mrf.mxu1  ;;  %v4438_v60 = vand.u32 4294901760, %v4395_v44  ;;  %v4455_v1 = vsub.f32 %v1120_v17, %v4426_v34  ;;  %v1265_v23 = vsub.f32 %v4412_v16, %v1264_v58  ;;  %v1256_v47 = vand.u32 4294901760, %v1255_v56 }
 0x19c   :  { %v4365_v46 = vand.u32 4294901760, %v1124_v33  ;;  %v1127_v51 = vmax.f32 %v1117_v22, 0.0  ;;  %v1111_v61 = vadd.f32 %v1110_v27, %v982_v42  ;;  %v4371_v45 = vsub.f32 %v1125_v7, %v4356_v9 }
 0x19d   :  { %v4452_v59 = vand.u32 4294901760, %v4415_v40  ;;  %v1330_v26 = vsub.f32 %v4395_v44, %v4438_v60  ;;  %v1275_v42 = vsub.f32 %v4430_v39, %v1274_v11  ;;  %v1266_v37 = vand.u32 4294901760, %v1265_v23 }
 0x19e   :  { %v4373_v43 = vand.u32 4294901760, %v1127_v51  ;;  %v1126_v13 = vmax.f32 %v1111_v61, 0.0  ;;  %v4383_v5 = vsub.f32 %v1124_v33, %v4365_v46  ;;  %v4405_v2 = vand.u32 4294901760, %v4371_v45 }
 0x19f   :  { %v1337_v10 = vsub.f32 %v4415_v40, %v4452_v59  ;;  %v4477_v33 = vand.u32 4294901760, %v4455_v1  ;;  %v1331_v22 = vand.u32 4294901760, %v1330_v26  ;;  %v1276_v27 = vand.u32 4294901760, %v1275_v42 }
 0x1a0   :  { %v4386_v30 = vsub.f32 %v1127_v51, %v4373_v43  ;;  %v4388_v28 = vand.u32 4294901760, %v1126_v13  ;;  %3409 = vmatprep.subr.mxu0 %v4373_v43  ;;  %v4424_v38 = vand.u32 4294901760, %v4383_v5  ;;  %v1316_v24 = vsub.f32 %v4371_v45, %v4405_v2 }
 0x1a1   :  { %3410 = vmatpush3.msra.mxu0 %v4373_v43  ;;  %v1338_v18 = vand.u32 4294901760, %v1337_v10  ;;  %v1351_v32 = vsub.f32 %v4455_v1, %v4477_v33  ;;  %v1345_v20 = vand.u32 4294901760, %v1344_v50 }
 0x1a2   :  { %v4398_v12 = vsub.f32 %v1126_v13, %v4388_v28  ;;  %3411 = vmatprep.subr.mxu0 %v4388_v28  ;;  %v4402_v19 = vand.u32 4294901760, %v4386_v30  ;;  %v1323_v29 = vsub.f32 %v4383_v5, %v4424_v38  ;;  %v1317_v7 = vand.u32 4294901760, %v1316_v24 }
 0x1a3   :  { %3412 = vmatpush3.msra.mxu0 %v4388_v28  ;;  %v1352_v51 = vand.u32 4294901760, %v1351_v32 }
 0x1a4   :  { %3413 = vmatprep.subr.mxu0 %v4356_v9  ;;  %v1302_v31 = vsub.f32 %v4386_v30, %v4402_v19  ;;  %v4421_v57 = vand.u32 4294901760, %v4398_v12  ;;  %v1324_v0 = vand.u32 4294901760, %v1323_v29 }
 0x1a5   :  { %3414 = vmatpush3.msra.mxu0 %v4356_v9 }
 0x1a6   :  { %3415 = vmatprep.subr.mxu0 %v4365_v46  ;;  %v1303_v48 = vand.u32 4294901760, %v1302_v31  ;;  %v1309_v3 = vsub.f32 %v4398_v12, %v4421_v57 }
 0x1a7   :  { %3416 = vmatpush3.msra.mxu0 %v4365_v46 }
 0x1a8   :  { %3417 = vmatprep.subr.mxu0 %v4368_v6  ;;  %3431 = vmatprep.subr.mxu1 %v1303_v48  ;;  %v1310_v52 = vand.u32 4294901760, %v1309_v3 }
 0x1a9   :  { %3418 = vmatpush3.msra.mxu0 %v4368_v6  ;;  %3432 = vmatpush3.msra.mxu1 %v1303_v48 }
 0x1aa   :  { %3419 = vmatprep.subr.mxu0 %v4380_v54  ;;  %3433 = vmatprep.subr.mxu1 %v1310_v52 }
 0x1ab   :  { %3420 = vmatpush3.msra.mxu0 %v4380_v54  ;;  %3434 = vmatpush3.msra.mxu1 %v1310_v52 }
 0x1ac   :  { %3421 = vmatprep.subr.mxu0 %v4407_v14  ;;  %3435 = vmatprep.subr.mxu1 %v1317_v7 }
 0x1ad   :  { %3422 = vmatpush3.msra.mxu0 %v4407_v14  ;;  %3436 = vmatpush3.msra.mxu1 %v1317_v7 }
 0x1ae   :  { %3423 = vmatprep.subr.mxu0 %v4426_v34  ;;  %3437 = vmatprep.subr.mxu1 %v1324_v0 }
 0x1af   :  { %3424 = vmatpush3.msra.mxu0 %v4426_v34  ;;  %3438 = vmatpush3.msra.mxu1 %v1324_v0 }
 0x1b0   :  { %3426 = vmatmul.mubr.f32.vlgmr.msra.gmra.mxu0 %v1256_v47  ;;  %3439 = vmatprep.subr.mxu1 %v1331_v22 }
 0x1b1   :  { %3453 = vmatprep.subr.mxu0 %v4386_v30  ;;  %3440 = vmatpush3.msra.mxu1 %v1331_v22 }
 0x1b2   :  { %3454 = vmatpush3.msra.mxu0 %v4386_v30  ;;  %3441 = vmatprep.subr.mxu1 %v1338_v18 }
 0x1b3   :  { %3455 = vmatprep.subr.mxu0 %v4398_v12  ;;  %3428 = vmatprep.mubr.f32.mxu0 %v1266_v37 }
 0x1b4   :  { %3442 = vmatpush3.msra.mxu1 %v1338_v18  ;;  %3456 = vmatpush3.msra.mxu0 %v4398_v12 }
 0x1b5   :  { %3429 = vmatmul.mubr.f32.gmra.mxu0 %v1276_v27  ;;  %3443 = vmatprep.subr.mxu1 %v1345_v20 }
 0x1b6   :  { %3457 = vmatprep.subr.mxu0 %v4371_v45  ;;  %3444 = vmatpush3.msra.mxu1 %v1345_v20 }
 0x1b7   :  { %3458 = vmatpush3.msra.mxu0 %v4371_v45  ;;  %3445 = vmatprep.subr.mxu1 %v1352_v51 }
 0x1b8   :  { %3459 = vmatprep.subr.mxu0 %v4383_v5  ;;  %3446 = vmatpush3.msra.mxu1 %v1352_v51 }
 0x1b9   :  { %3460 = vmatpush3.msra.mxu0 %v4383_v5  ;;  %3448 = vmatmul.mubr.f32.vlgmr.msra.gmra.mxu1 %v4362_v35 }
 0x1ba   :  { %3461 = vmatprep.subr.mxu0 %v4395_v44  ;;  %3475 = vmatprep.subr.mxu1 %v4373_v43 }
 0x1bb   :  { %3462 = vmatpush3.msra.mxu0 %v4395_v44  ;;  %3476 = vmatpush3.msra.mxu1 %v4373_v43 }
 0x1bc   :  { %3463 = vmatprep.subr.mxu0 %v4415_v40  ;;  %3477 = vmatprep.subr.mxu1 %v4388_v28 }
 0x1bd   :  { %3450 = vmatprep.mubr.f32.mxu1 %v4378_v36  ;;  %3464 = vmatpush3.msra.mxu0 %v4415_v40 }
 0x1be   :  { %3478 = vmatpush3.msra.mxu1 %v4388_v28  ;;  %3465 = vmatprep.subr.mxu0 %v4441_v15 }
 0x1bf   :  { %3451 = vmatmul.mubr.f32.gmra.mxu1 %v4392_v8  ;;  %3479 = vmatprep.subr.mxu1 %v4356_v9 }
 0x1c0   :  { %3466 = vmatpush3.msra.mxu0 %v4441_v15  ;;  %3480 = vmatpush3.msra.mxu1 %v4356_v9 }
 0x1c1   :  { %3467 = vmatprep.subr.mxu0 %v4455_v1  ;;  %3481 = vmatprep.subr.mxu1 %v4365_v46 }
 0x1c2   :  { %3468 = vmatpush3.msra.mxu0 %v4455_v1  ;;  %3469 = vmatprep.mubr.f32.mxu0 %v4319_v53 }
 0x1c3   :  { %3482 = vmatpush3.msra.mxu1 %v4365_v46  ;;  %3470 = vmatmul.mubr.f32.vlgmr.msra.gmra.mxu0 %v4376_v62 }
 0x1c4   :  { %3483 = vmatprep.subr.mxu1 %v4368_v6  ;;  %3497 = vmatprep.subr.mxu0 %v4402_v19 }
 0x1c5   :  { %3484 = vmatpush3.msra.mxu1 %v4368_v6  ;;  %3498 = vmatpush3.msra.mxu0 %v4402_v19 }
 0x1c6   :  { %3485 = vmatprep.subr.mxu1 %v4380_v54  ;;  %3499 = vmatprep.subr.mxu0 %v4421_v57 }
 0x1c7   :  { %3472 = vmatprep.mubr.f32.mxu0 %v4412_v16  ;;  %3486 = vmatpush3.msra.mxu1 %v4380_v54 }
 0x1c8   :  { %3500 = vmatpush3.msra.mxu0 %v4421_v57  ;;  %3487 = vmatprep.subr.mxu1 %v4407_v14 }
 0x1c9   :  { %3473 = vmatmul.mubr.f32.gmra.mxu0 %v4430_v39  ;;  %3501 = vmatprep.subr.mxu0 %v4405_v2 }
 0x1ca   :  { %3488 = vmatpush3.msra.mxu1 %v4407_v14  ;;  %3502 = vmatpush3.msra.mxu0 %v4405_v2 }
 0x1cb   :  { %3489 = vmatprep.subr.mxu1 %v4426_v34  ;;  %3503 = vmatprep.subr.mxu0 %v4424_v38 }
 0x1cc   :  { %3490 = vmatpush3.msra.mxu1 %v4426_v34  ;;  %3491 = vmatprep.mubr.f32.mxu1 %v1244_v55 }
 0x1cd   :  { %3504 = vmatpush3.msra.mxu0 %v4424_v38  ;;  %3492 = vmatmul.mubr.f32.vlgmr.msra.gmra.mxu1 %v1254_v49  ;;  %v1840_v49 = vld [vmem:[%s4687_s5 + $0x8] sm:$0xff] }
 0x1ce   :  { %3505 = vmatprep.subr.mxu0 %v4438_v60  ;;  %3519 = vmatprep.subr.mxu1 %v4373_v43  ;;  %v1858_v48 = vsel %vm1853_vm2, %v1840_v49, 0 }
 0x1cf   :  { %3506 = vmatpush3.msra.mxu0 %v4438_v60  ;;  %3520 = vmatpush3.msra.mxu1 %v4373_v43  ;;  %v4590_v29 = vand.u32 4294901760, %v1858_v48 }
 0x1d0   :  { %3507 = vmatprep.subr.mxu0 %v4452_v59  ;;  %3521 = vmatprep.subr.mxu1 %v4388_v28 }
 0x1d1   :  { %3494 = vmatprep.mubr.f32.mxu1 %v1264_v58  ;;  %3508 = vmatpush3.msra.mxu0 %v4452_v59  ;;  %v4593_v42 = vsub.f32 %v1858_v48, %v4590_v29 }
 0x1d2   :  { %3522 = vmatpush3.msra.mxu1 %v4388_v28  ;;  %3509 = vmatprep.subr.mxu0 %v4467_v21  ;;  %v1149_v28 = vpop.permute.xlu1 %1148 }
 0x1d3   :  { %3495 = vmatmul.mubr.f32.gmra.mxu1 %v1274_v11  ;;  %3523 = vmatprep.subr.mxu1 %v4356_v9 }
 0x1d4   :  { %3510 = vmatpush3.msra.mxu0 %v4467_v21  ;;  %3524 = vmatpush3.msra.mxu1 %v4356_v9 }
 0x1d5   :  { %3511 = vmatprep.subr.mxu0 %v4477_v33  ;;  %3525 = vmatprep.subr.mxu1 %v4365_v46 }
 0x1d6   :  { %3512 = vmatpush3.msra.mxu0 %v4477_v33  ;;  %3513 = vmatprep.mubr.f32.mxu0 %v4316_v41 }
 0x1d7   :  { %3526 = vmatpush3.msra.mxu1 %v4365_v46  ;;  %3514 = vmatmul.mubr.f32.vlgmr.msra.gmra.mxu0 %v4362_v35 }
 0x1d8   :  { %3527 = vmatprep.subr.mxu1 %v4368_v6  ;;  %3516 = vmatprep.mubr.f32.mxu0 %v4378_v36 }
 0x1d9   :  { %3528 = vmatpush3.msra.mxu1 %v4368_v6  ;;  %3535 = vmatprep.mubr.f32.mxu1 %v4316_v41  ;;  %v1839_v41 = vld [vmem:[%s4687_s5] sm:$0xff] }
 0x1da   :  { %3529 = vmatprep.subr.mxu1 %v4380_v54  ;;  %v1855_v53 = vsel %vm1853_vm2, %v1839_v41, 0 }
 0x1db   :  { %3530 = vmatpush3.msra.mxu1 %v4380_v54  ;;  %3517 = vmatmul.mubr.f32.gmra.mxu0 %v4392_v8  ;;  %v4576_v55 = vand.u32 4294901760, %v1855_v53  ;;  %v1154_v54 = vpop.permute.xlu0 %1153 }
 0x1dc   :  { %3531 = vmatprep.subr.mxu1 %v4407_v14 }
 0x1dd   :  { %3532 = vmatpush3.msra.mxu1 %v4407_v14  ;;  %v4579_v9 = vsub.f32 %v1855_v53, %v4576_v55  ;;  %v1139_v14 = vpop.permute.xlu1 %1138 }
 0x1de   :  { %3533 = vmatprep.subr.mxu1 %v4426_v34 }
 0x1df   :  { %3534 = vmatpush3.msra.mxu1 %v4426_v34  ;;  %v1144_v44 = vpop.permute.xlu0 %1143 }
 0x1e0   :  { %3536 = vmatmul.mubr.f32.vlgmr.msra.gmra.mxu1 %v4362_v35  ;;  %v1931_v35 = vand.u32 4294901760, %v4579_v9 }
 0x1e1   :  { %3538 = vmatprep.mubr.f32.mxu1 %v4378_v36 }
 0x1e2   :  { %v1932_v46 = vsub.f32 %v4579_v9, %v1931_v35 }
 0x1e4   :  { %3539 = vmatmul.mubr.f32.gmra.mxu1 %v4392_v8  ;;  %v1933_v61 = vand.u32 4294901760, %v1932_v46 }
 0x1e5   :  { %3560 = vmatprep.mubr.f32.mxu1 %v4576_v55 }
 0x1e6   :  { %3549 = vmatprep.mubr.f32.mxu0 %v1933_v61 }
 0x270   :  { %v3427_v25 = vpop.f32.mrf.mxu0 }
 0x271   :  { %v1259_v19 = vadd.f32 %v3427_v25, %v1144_v44  ;;  %v1941_v25 = vand.u32 4294901760, %v4593_v42 }
 0x272   :  { %v1248_v4 = vpop.f32.mrf.mxu0 }
 0x273   :  { %v1249_v16 = vadd.f32 %v1248_v4, %v1139_v14 }
 0x275   :  { %v3430_v6 = vpop.f32.mrf.mxu0 }
 0x276   :  { %v1279_v38 = vadd.f32 %v3430_v6, %v1154_v54 }
 0x277   :  { %v1268_v43 = vpop.f32.mrf.mxu0 }
 0x278   :  { %v1269_v3 = vadd.f32 %v1268_v43, %v1149_v28 }
 0x279   :  { %v3449_v45 = vpop.f32.mrf.mxu1 }
 0x27a   :  { %v1396_v40 = vadd.f32 %v3449_v45, %v1259_v19 }
 0x27b   :  { %v1389_v13 = vpop.f32.mrf.mxu1 }
 0x27c   :  { %v1390_v34 = vadd.f32 %v1389_v13, %v1249_v16 }
 0x27f   :  { %v3452_v62 = vpop.f32.mrf.mxu1 }
 0x280   :  { %v1408_v24 = vadd.f32 %v3452_v62, %v1279_v38  ;;  %v1942_v62 = vsub.f32 %v4593_v42, %v1941_v25  ;;  %v1846_v38 = vpop.permute.xlu1 %1845 }
 0x281   :  { %v1401_v5 = vpop.f32.mrf.mxu1 }
 0x282   :  { %v1402_v56 = vadd.f32 %v1401_v5, %v1269_v3 }
 0x283   :  { %v3471_v63 = vpop.f32.mrf.mxu0 }
 0x284   :  { %v1503_v39 = vadd.f32 %v3471_v63, %v1396_v40  ;;  %v2390_v40 = vld [vmem:[%s4689_s7] sm:$0x3]  ;;  %s3680_s7 = smov [#allocation2]  }
 0x285   :  { %v1495_v36 = vpop.f32.mrf.mxu0  ;;  %s2867_s28 = sshll.u32 %s3680_s7, 4  ;;  %s2868_s28 = int_to_ptr.vmem [resolvable:$true] %s2867_s28 }
 0x286   :  { %v1496_v60 = vadd.f32 %v1495_v36, %v1390_v34  ;;  %s3655_s1 = scalar_lea.vmem %s2868_s28, 32  ;;  %p3660_p1 = scmp.lt.s32.totalorder %s2868_s28, %s2868_s28 }
 0x287   :  { %p3656_p0 = scmp.ne.s32.totalorder %s2868_s28, %s3655_s1  ;;  %p3661_p2 = scmp.lt.s32.totalorder %s3655_s1, %s3655_s1 }
 0x289   :  { %v3474_v30 = vpop.f32.mrf.mxu0  ;;  %p3662_p3 = por %p3661_p2, %p3660_p1 }
 0x28a   :  { %v1517_v59 = vadd.f32 %v3474_v30, %v1408_v24  ;;  %v1943_v30 = vand.u32 4294901760, %v1942_v62 }
 0x28b   :  { %v1509_v8 = vpop.f32.mrf.mxu0  ;;  %p3663_p4 = pnand %p3662_p3, %p3656_p0 }
 0x28c   :  { %v1510_v26 = vadd.f32 %v1509_v8, %v1402_v56 }
 0x28d   :  { %v3493_v17 = vpop.f32.mrf.mxu1 }
 0x28e   :  { %v1606_v15 = vadd.f32 %v3493_v17, %v1503_v39  ;;  %v2399_v39 = vsel %vm2397_vm4, %v2390_v40, 0 }
 0x28f   :  { %v1597_v12 = vpop.f32.mrf.mxu1 }
 0x290   :  { %v1598_v1 = vadd.f32 %v1597_v12, %v1496_v60 }
 0x293   :  { %v3496_v31 = vpop.f32.mrf.mxu1 }
 0x294   :  { %v1622_v23 = vadd.f32 %v3496_v31, %v1517_v59  ;;  %v1851_v31 = vpop.permute.xlu0 %1850 }
 0x295   :  { %v1613_v58 = vpop.f32.mrf.mxu1 }
 0x296   :  { %v1614_v33 = vadd.f32 %v1613_v58, %v1510_v26 }
 0x297   :  { %v3515_v2 = vpop.f32.mrf.mxu0 }
 0x298   :  { %v1723_v11 = vadd.f32 %v3515_v2, %v1606_v15  ;;  %v4655_v15 = vand.u32 4294901760, %v2399_v39  ;;  %v2395_v62 = vpop.permute.xlu0 %2394 }
 0x299   :  { %v1716_v57 = vpop.f32.mrf.mxu0 }
 0x29a   :  { %v1717_v21 = vadd.f32 %v1716_v57, %v1598_v1 }
 0x29b   :  { %v3518_v52 = vpop.f32.mrf.mxu0 }
 0x29c   :  { %v1735_v22 = vadd.f32 %v3518_v52, %v1622_v23 }
 0x29d   :  { %v1728_v47 = vpop.f32.mrf.mxu0 }
 0x29e   :  { %v1729_v27 = vadd.f32 %v1728_v47, %v1614_v33 }
 0x2a0   :  { %v3537_v7 = vpop.f32.mrf.mxu1 }
 0x2a1   :  { %v1820_v0 = vadd.f32 %v3537_v7, %v1723_v11  ;;  %v2469_v11 = vsub.f32 %v2399_v39, %v4655_v15 }
 0x2a2   :  { %v1813_v10 = vpop.f32.mrf.mxu1 }
 0x2a3   :  { %v1836_v37 = vmax.f32 %v1820_v0, 0.0  ;;  %v1814_v50 = vadd.f32 %v1813_v10, %v1717_v21  ;;  %v2470_v0 = vand.u32 4294901760, %v2469_v11 }
 0x2a4   :  { %v3540_v18 = vpop.f32.mrf.mxu1 }
 0x2a5   :  { %v4595_v32 = vand.u32 4294901760, %v1836_v37  ;;  %v1835_v20 = vmax.f32 %v1814_v50, 0.0  ;;  %v1832_v51 = vadd.f32 %v3540_v18, %v1735_v22 }
 0x2a6   :  { %v1825_v41 = vpop.f32.mrf.mxu1 }
 0x2a7   :  { %v4597_v53 = vand.u32 4294901760, %v1835_v20  ;;  %v1838_v46 = vmax.f32 %v1832_v51, 0.0  ;;  %v1826_v61 = vadd.f32 %v1825_v41, %v1729_v27  ;;  %v1989_v4 = vsub.f32 %v1836_v37, %v4595_v32 }
 0x2a8   :  { %v2471_v37 = vsub.f32 %v2469_v11, %v2470_v0 }
 0x2a9   :  { %v4601_v6 = vand.u32 4294901760, %v1838_v46  ;;  %v1837_v45 = vmax.f32 %v1826_v61, 0.0  ;;  %v1996_v43 = vsub.f32 %v1835_v20, %v4597_v53  ;;  %v1990_v5 = vand.u32 4294901760, %v1989_v4 }
 0x2aa   :  { %v2472_v20 = vand.u32 4294901760, %v2471_v37 }
 0x2ab   :  { %v1975_v13 = vsub.f32 %v1838_v46, %v4601_v6  ;;  %v4605_v63 = vand.u32 4294901760, %v1837_v45  ;;  %3541 = vmatprep.subr.mxu0 %v4601_v6  ;;  %v1997_v8 = vand.u32 4294901760, %v1996_v43  ;;  %v1991_v19 = vsub.f32 %v1989_v4, %v1990_v5 }
 0x2ac   :  { %3542 = vmatpush3.msra.mxu0 %v4601_v6 }
 0x2ad   :  { %v1982_v36 = vsub.f32 %v1837_v45, %v4605_v63  ;;  %3543 = vmatprep.subr.mxu0 %v4605_v63  ;;  %v1976_v54 = vand.u32 4294901760, %v1975_v13  ;;  %v1998_v14 = vsub.f32 %v1996_v43, %v1997_v8  ;;  %v1992_v49 = vand.u32 4294901760, %v1991_v19 }
 0x2ae   :  { %3544 = vmatpush3.msra.mxu0 %v4605_v63 }
 0x2af   :  { %3545 = vmatprep.subr.mxu0 %v4595_v32  ;;  %v1977_v28 = vsub.f32 %v1975_v13, %v1976_v54  ;;  %v1983_v17 = vand.u32 4294901760, %v1982_v36  ;;  %v1999_v16 = vand.u32 4294901760, %v1998_v14 }
 0x2b0   :  { %3546 = vmatpush3.msra.mxu0 %v4595_v32 }
 0x2b1   :  { %3547 = vmatprep.subr.mxu0 %v4597_v53  ;;  %v1978_v44 = vand.u32 4294901760, %v1977_v28  ;;  %v1984_v12 = vsub.f32 %v1982_v36, %v1983_v17 }
 0x2b2   :  { %3548 = vmatpush3.msra.mxu0 %v4597_v53 }
 0x2b3   :  { %3550 = vmatmul.mubr.f32.vlgmr.msra.gmra.mxu0 %v1943_v30  ;;  %3552 = vmatprep.subr.mxu1 %v1978_v44  ;;  %v1985_v2 = vand.u32 4294901760, %v1984_v12 }
 0x2b4   :  { %3563 = vmatprep.subr.mxu0 %v1975_v13  ;;  %3553 = vmatpush3.msra.mxu1 %v1978_v44 }
 0x2b5   :  { %3564 = vmatpush3.msra.mxu0 %v1975_v13  ;;  %3554 = vmatprep.subr.mxu1 %v1985_v2 }
 0x2b6   :  { %3565 = vmatprep.subr.mxu0 %v1982_v36  ;;  %3555 = vmatpush3.msra.mxu1 %v1985_v2 }
 0x2b7   :  { %3566 = vmatpush3.msra.mxu0 %v1982_v36  ;;  %3556 = vmatprep.subr.mxu1 %v1992_v49 }
 0x2b8   :  { %3567 = vmatprep.subr.mxu0 %v1989_v4  ;;  %3557 = vmatpush3.msra.mxu1 %v1992_v49 }
 0x2b9   :  { %3568 = vmatpush3.msra.mxu0 %v1989_v4  ;;  %3558 = vmatprep.subr.mxu1 %v1999_v16 }
 0x2ba   :  { %3569 = vmatprep.subr.mxu0 %v1996_v43  ;;  %3559 = vmatpush3.msra.mxu1 %v1999_v16 }
 0x2bb   :  { %3570 = vmatpush3.msra.mxu0 %v1996_v43  ;;  %3561 = vmatmul.mubr.f32.vlgmr.msra.gmra.mxu1 %v4590_v29 }
 0x2bc   :  { %3571 = vmatprep.mubr.f32.mxu0 %v4579_v9  ;;  %3574 = vmatprep.subr.mxu1 %v4601_v6  ;;  %v3678_v9 = vmov 0.0  }
 0x2bd   :  { %3585 = vmatprep.subr.mxu0 %v1976_v54  ;;  %3572 = vmatmul.mubr.f32.vlgmr.msra.gmra.mxu0 %v4593_v42 }
 0x2be   :  { %3575 = vmatpush3.msra.mxu1 %v4601_v6  ;;  %3586 = vmatpush3.msra.mxu0 %v1976_v54 }
 0x2bf   :  { %3576 = vmatprep.subr.mxu1 %v4605_v63  ;;  %3587 = vmatprep.subr.mxu0 %v1983_v17 }
 0x2c0   :  { %3577 = vmatpush3.msra.mxu1 %v4605_v63  ;;  %3588 = vmatpush3.msra.mxu0 %v1983_v17 }
 0x2c1   :  { %3578 = vmatprep.subr.mxu1 %v4595_v32  ;;  %3589 = vmatprep.subr.mxu0 %v1990_v5 }
 0x2c2   :  { %3579 = vmatpush3.msra.mxu1 %v4595_v32  ;;  %3590 = vmatpush3.msra.mxu0 %v1990_v5 }
 0x2c3   :  { %3580 = vmatprep.subr.mxu1 %v4597_v53  ;;  %3591 = vmatprep.subr.mxu0 %v1997_v8 }
 0x2c4   :  { %3581 = vmatpush3.msra.mxu1 %v4597_v53  ;;  %3582 = vmatprep.mubr.f32.mxu1 %v1931_v35 }
 0x2c5   :  { %3592 = vmatpush3.msra.mxu0 %v1997_v8  ;;  %3583 = vmatmul.mubr.f32.vlgmr.msra.gmra.mxu1 %v1941_v25 }
 0x2c6   :  { %3596 = vmatprep.subr.mxu1 %v4601_v6  ;;  %3593 = vmatprep.mubr.f32.mxu0 %v4576_v55 }
 0x2c7   :  { %3597 = vmatpush3.msra.mxu1 %v4601_v6  ;;  %3594 = vmatmul.mubr.f32.vlgmr.msra.gmra.mxu0 %v4590_v29 }
 0x2c8   :  { %3598 = vmatprep.subr.mxu1 %v4605_v63  ;;  %3604 = vmatprep.mubr.f32.mxu1 %v4576_v55 }
 0x2c9   :  { %3599 = vmatpush3.msra.mxu1 %v4605_v63  ;;  %3607 = vmatprep.subr.mxu0 %v3678_v9 }
 0x2ca   :  { %3600 = vmatprep.subr.mxu1 %v4595_v32  ;;  %3611 = vmatprep.mubr.msk.f32.mxu0 %vm3679_vm3, %v3678_v9 }
 0x2cb   :  { %3601 = vmatpush3.msra.mxu1 %v4595_v32 }
 0x2cc   :  { %3602 = vmatprep.subr.mxu1 %v4597_v53 }
 0x2cd   :  { %3603 = vmatpush3.msra.mxu1 %v4597_v53 }
 0x2ce   :  { %3605 = vmatmul.mubr.f32.vlgmr.msra.gmra.mxu1 %v4590_v29  ;;  %3614 = vmatprep.subr.mxu1 %v3678_v9 }
 0x2cf   :  { %3618 = vmatprep.mubr.msk.f32.mxu1 %vm3679_vm3, %v3678_v9 }
 0x373   :  { %v3551_v55 = vpop.f32.mrf.mxu0 }
 0x374   :  { %v1946_v34 = vadd.f32 %v3551_v55, %v1851_v31 }
 0x375   :  { %v1935_v57 = vpop.f32.mrf.mxu0 }
 0x376   :  { %v1936_v24 = vadd.f32 %v1935_v57, %v1846_v38 }
 0x37b   :  { %v3562_v35 = vpop.f32.mrf.mxu1 }
 0x37c   :  { %v2043_v60 = vadd.f32 %v3562_v35, %v1946_v34 }
 0x37d   :  { %v2036_v48 = vpop.f32.mrf.mxu1  ;;  %v3573_v3 = vpop.f32.mrf.mxu0 }
 0x37e   :  { %v2037_v58 = vadd.f32 %v2036_v48, %v1936_v24  ;;  %v2130_v56 = vadd.f32 %v3573_v3, %v2043_v60 }
 0x37f   :  { %v2122_v29 = vpop.f32.mrf.mxu0 }
 0x380   :  { %v2123_v7 = vadd.f32 %v2122_v29, %v2037_v58 }
 0x385   :  { %v3584_v52 = vpop.f32.mrf.mxu1 }
 0x386   :  { %v2215_v26 = vadd.f32 %v3584_v52, %v2130_v56 }
 0x387   :  { %v2206_v59 = vpop.f32.mrf.mxu1  ;;  %v3595_v1 = vpop.f32.mrf.mxu0 }
 0x388   :  { %v2207_v23 = vadd.f32 %v2206_v59, %v2123_v7  ;;  %v2304_v47 = vadd.f32 %v3595_v1, %v2215_v26 }
 0x389   :  { %v2297_v21 = vpop.f32.mrf.mxu0 }
 0x38a   :  { %v2298_v42 = vadd.f32 %v2297_v21, %v2207_v23 }
 0x38e   :  { %v3606_v10 = vpop.f32.mrf.mxu1 }
 0x38f   :  { %v2385_v33 = vadd.f32 %v3606_v10, %v2304_v47 }
 0x390   :  { %v2378_v22 = vpop.f32.mrf.mxu1 }
 0x391   :  { %v2389_v50 = vmax.f32 %v2385_v33, 0.0  ;;  %v2379_v18 = vadd.f32 %v2378_v22, %v2298_v42 }
 0x393   :  { %v2430_v27 = vand.u32 4294901760, %v2389_v50  ;;  %v2388_v32 = vmax.f32 %v2379_v18, 0.0 }
 0x395   :  { %v2508_v51 = vsub.f32 %v2389_v50, %v2430_v27  ;;  %v2433_v41 = vand.u32 4294901760, %v2388_v32  ;;  %3608 = vmatpush3.msra.mxu0 %v2430_v27 }
 0x396   :  { %3609 = vmatprep.subr.mxu0 %v3678_v9 }
 0x397   :  { %v2509_v53 = vand.u32 4294901760, %v2508_v51  ;;  %v2515_v46 = vsub.f32 %v2388_v32, %v2433_v41  ;;  %3610 = vmatpush3.msra.mxu0 %v2433_v41 }
 0x398   :  { %3612 = vmatmul.mubr.f32.vlgmr.msra.gmra.mxu0 %v2472_v20  ;;  %3621 = vmatprep.subr.mxu0 %v3678_v9 }
 0x399   :  { %v2510_v61 = vsub.f32 %v2508_v51, %v2509_v53  ;;  %v2516_v25 = vand.u32 4294901760, %v2515_v46  ;;  %3622 = vmatpush3.msra.mxu0 %v2508_v51  ;;  %3625 = vmatprep.mubr.msk.f32.mxu0 %vm3679_vm3, %v3678_v9 }
 0x39a   :  { %3623 = vmatprep.subr.mxu0 %v3678_v9 }
 0x39b   :  { %v2517_v4 = vsub.f32 %v2515_v46, %v2516_v25  ;;  %3624 = vmatpush3.msra.mxu0 %v2515_v46  ;;  %v2511_v6 = vand.u32 4294901760, %v2510_v61 }
 0x39c   :  { %3635 = vmatprep.subr.mxu0 %v3678_v9  ;;  %3626 = vmatmul.mubr.f32.vlgmr.msra.gmra.mxu0 %v2469_v11 }
 0x39d   :  { %3615 = vmatpush3.msra.mxu1 %v2511_v6  ;;  %3636 = vmatpush3.msra.mxu0 %v2509_v53  ;;  %v2518_v45 = vand.u32 4294901760, %v2517_v4 }
 0x39e   :  { %3616 = vmatprep.subr.mxu1 %v3678_v9  ;;  %3637 = vmatprep.subr.mxu0 %v3678_v9 }
 0x39f   :  { %3617 = vmatpush3.msra.mxu1 %v2518_v45  ;;  %3638 = vmatpush3.msra.mxu0 %v2516_v25 }
 0x3a0   :  { %3619 = vmatmul.mubr.f32.vlgmr.msra.gmra.mxu1 %v4655_v15  ;;  %3628 = vmatprep.subr.mxu1 %v3678_v9 }
 0x3a1   :  { %3629 = vmatpush3.msra.mxu1 %v2430_v27  ;;  %3632 = vmatprep.mubr.msk.f32.mxu1 %vm3679_vm3, %v3678_v9 }
 0x3a2   :  { %3630 = vmatprep.subr.mxu1 %v3678_v9  ;;  %3639 = vmatprep.mubr.msk.f32.mxu0 %vm3679_vm3, %v3678_v9 }
 0x3a3   :  { %3631 = vmatpush3.msra.mxu1 %v2433_v41  ;;  %3640 = vmatmul.mubr.f32.vlgmr.msra.gmra.mxu0 %v4655_v15 }
 0x3a4   :  { %3633 = vmatmul.mubr.f32.vlgmr.msra.gmra.mxu1 %v2470_v0  ;;  %3642 = vmatprep.subr.mxu1 %v3678_v9 }
 0x3a5   :  { %3643 = vmatpush3.msra.mxu1 %v2430_v27  ;;  %3646 = vmatprep.mubr.msk.f32.mxu1 %vm3679_vm3, %v3678_v9 }
 0x3a6   :  { %3644 = vmatprep.subr.mxu1 %v3678_v9 }
 0x3a7   :  { %3645 = vmatpush3.msra.mxu1 %v2433_v41 }
 0x3a8   :  { %3647 = vmatmul.mubr.f32.vlgmr.msra.gmra.mxu1 %v4655_v15 }
 0x458   :  { %v2474_v43 = vpop.f32.mrf.mxu0 }
 0x459   :  { %v2475_v54 = vadd.f32 %v2474_v43, %v2395_v62 }
 0x45a   :  { %v3613_v13 = vpop.f32.mrf.mxu0 }
 0x45c   :  { %v2631_v63 = vpop.f32.mrf.mxu0 }
 0x45e   :  { %v3627_v36 = vpop.f32.mrf.mxu0 }
 0x460   :  { %v2555_v5 = vpop.f32.mrf.mxu1 }
 0x461   :  { %v2556_v30 = vadd.f32 %v2555_v5, %v2475_v54 }
 0x462   :  { %v3620_v28 = vpop.f32.mrf.mxu1 }
 0x463   :  { %v2632_v17 = vadd.f32 %v2631_v63, %v2556_v30  ;;  %v2783_v8 = vpop.f32.mrf.mxu0 }
 0x464   :  { %v2706_v44 = vpop.f32.mrf.mxu1 }
 0x465   :  { %v2707_v12 = vadd.f32 %v2706_v44, %v2632_v17  ;;  %v3641_v19 = vpop.f32.mrf.mxu0 }
 0x466   :  { %v3634_v2 = vpop.f32.mrf.mxu1 }
 0x467   :  { %v2784_v14 = vadd.f32 %v2783_v8, %v2707_v12 }
 0x468   :  { %v2856_v49 = vpop.f32.mrf.mxu1 }
 0x469   :  { %v2857_v16 = vadd.f32 %v2856_v49, %v2784_v14 }
 0x46a   :  { %v3648_v9 = vpop.f32.mrf.mxu1 }
 0x46b   :  { %2860 = vst [vmem:[#allocation2] sm:$0x3] %v2857_v16 }
 0x46c   :  { %3666 = shalt.err (!%p3663_p4)
}
 0x46d   :  { %2870 = dma.vmem_to_hbm [thread:$0]  %s2868_s28, 32, %s4691_s9, [#allocation3]  }
 0x46e   :  { %3675 = dma.done.wait [#allocation3], 32  }
 0x46f   :  { %3676 = vsyncadd [#allocation3], 4294967264 }
 0x470   :  { %2874 = vsyncpa [#allocation3], 1 }

</bundles_post_ra>
